<compile_context>
chip_gen: v6e
topology: v6e:2x2x1
jax: 0.10.0
libtpu: 0.0.40
codegen_flags: <defaults>
</compile_context>

<pallas_src>
import functools

import jax
import jax.numpy as jnp
from jax.experimental import pallas as pl
from jax.experimental.pallas import tpu as pltpu


def _round_up(n, m):
    return (n + m - 1) // m * m


def _cdiv(a, b):
    return (a + b - 1) // b


def mlp_kernel(x_ref,
               w0_ref, b0_ref,
               w1_ref, b1_ref,
               w2_ref, b2_ref,
               g_ref, beta_ref,
               w3_ref, b3_ref,
               o_ref,
               *, hidden_real, act_dtype):
    """Fused MLP forward for one batch tile (everything resident in VMEM)."""

    def matmul(h, w_ref):
        # MXU matmul with f32 accumulation; inputs already in the MXU dtype
        # except the post-LayerNorm f32 activations (cast once here).
        if h.dtype != w_ref.dtype:
            h = h.astype(w_ref.dtype)
        return jnp.dot(h, w_ref[...], preferred_element_type=jnp.float32)

    # Three hidden layers: bias-add + ReLU in act_dtype (bf16 on v6e/v7x ->
    # half the VALU traffic / vreg pressure; f32 when use_bf16=False).
    h = x_ref[...]
    for w_ref, b_ref in ((w0_ref, b0_ref), (w1_ref, b1_ref), (w2_ref, b2_ref)):
        h = jnp.maximum(matmul(h, w_ref).astype(act_dtype) + b_ref[...], 0.0)

    # LayerNorm over the *real* hidden width (eps=1e-5, affine), in f32.
    # Padded hidden columns of h are exactly zero (zero-padded weights/biases,
    # ReLU(0)=0), so sum(h) over all columns == sum over real columns.  The
    # padded columns of d = h - mean equal exactly -mean, so the variance is
    # corrected analytically instead of masking the full tile.
    hf = h.astype(jnp.float32)
    inv_n = 1.0 / float(hidden_real)
    n_pad = hf.shape[-1] - hidden_real
    mean = jnp.sum(hf, axis=-1, keepdims=True) * inv_n
    d = hf - mean                                     # computed once, reused
    var = jnp.sum(d * d, axis=-1, keepdims=True) * inv_n
    if n_pad:
        var = var - (float(n_pad) * inv_n) * (mean * mean)
    hn = d * jax.lax.rsqrt(var + 1e-5)                # rsqrt -> EUP (free slot)
    hn = hn * g_ref[...] + beta_ref[...]              # padded cols -> 0 (g,beta padded 0)

    # Final Linear(hidden, n_out); bias add stays in f32.
    out = matmul(hn, w3_ref) + b3_ref[...]
    o_ref[...] = out.astype(o_ref.dtype)


def mlp_forward(x, params, *, block_b=256, use_bf16=True):
    """x: [B, n_in] float32. params: dict of weights. Returns [B, n_out] f32."""
    B, n_in = x.shape
    hidden = params["w0"].shape[1]
    n_out = params["w3"].shape[1]
    out_dtype = x.dtype

    LANE = 128   # TODO(synk): 256 on v6e/v7x once real feature dims exceed 128
    n_in_p = _round_up(n_in, LANE)
    hid_p = _round_up(hidden, LANE)
    n_out_p = _round_up(n_out, LANE)

    # Grid shaping: always >= 2 "parallel" steps, bb near block_b at large B,
    # last-tile dead rows minimized.
    n_steps = max(2, _cdiv(B, block_b))
    bb = min(_round_up(_cdiv(B, n_steps), 8), _round_up(B, 8))
    B_p = _round_up(B, bb)
    grid = (B_p // bb,)

    w_dtype = jnp.bfloat16 if use_bf16 else out_dtype
    act_dtype = w_dtype   # inter-layer activations live in the MXU dtype

    def pad2(a, rows, cols, dtype=None):
        if dtype is not None and a.dtype != dtype:
            a = a.astype(dtype)   # fuses with the pad; no extra XLA pass
        return jnp.pad(a, ((0, rows - a.shape[0]), (0, cols - a.shape[1])))

    # Zero-pad everything to lane-dense shapes; x and the hidden-layer params
    # are pre-cast once to the MXU / activation dtype in the wrapper.
    xp = pad2(x, B_p, n_in_p, w_dtype)             # halves x HBM->VMEM bytes
    w0 = pad2(params["w0"], n_in_p, hid_p, w_dtype)
    b0 = pad2(params["b0"], 1, hid_p, act_dtype)
    w1 = pad2(params["w1"], hid_p, hid_p, w_dtype)
    b1 = pad2(params["b1"], 1, hid_p, act_dtype)
    w2 = pad2(params["w2"], hid_p, hid_p, w_dtype)
    b2 = pad2(params["b2"], 1, hid_p, act_dtype)
    ln_g = pad2(params["ln_g"], 1, hid_p)          # LayerNorm math stays f32
    ln_b = pad2(params["ln_b"], 1, hid_p)
    w3 = pad2(params["w3"], hid_p, n_out_p, w_dtype)
    b3 = pad2(params["b3"], 1, n_out_p)            # final bias add in f32

    # Grid-invariant parameters: full-array blocks, single-buffered.
    def rep(a):
        return pl.BlockSpec(a.shape, lambda i: (0, 0),
                            pipeline_mode=pl.Buffered(1))

    # Explicit VMEM budget: single-buffered weights + double-buffered x/out
    # tiles + a few live f32 activation temps, with margin; clamped to 48 MiB
    # so the same budget also fits v7x's 64 MiB physical VMEM.
    wb = jnp.dtype(w_dtype).itemsize
    weight_bytes = ((n_in_p + 2 * hid_p + n_out_p) * hid_p) * wb \
        + 3 * hid_p * wb + (2 * hid_p + n_out_p) * 4
    io_bytes = 2 * bb * n_in_p * wb + 2 * bb * n_out_p * 4
    act_bytes = 4 * bb * hid_p * 4
    vmem_limit = int(min(max(4 * (weight_bytes + io_bytes + act_bytes),
                             32 << 20), 48 << 20))

    kernel = functools.partial(mlp_kernel,
                               hidden_real=hidden,
                               act_dtype=act_dtype)

    out_p = pl.pallas_call(
        kernel,
        out_shape=jax.ShapeDtypeStruct((B_p, n_out_p), out_dtype),
        grid_spec=pltpu.PrefetchScalarGridSpec(
            num_scalar_prefetch=0,
            grid=grid,
            in_specs=[
                pl.BlockSpec((bb, n_in_p), lambda i: (i, 0)),   # streamed x tile
                rep(w0), rep(b0),
                rep(w1), rep(b1),
                rep(w2), rep(b2),
                rep(ln_g), rep(ln_b),
                rep(w3), rep(b3),
            ],
            out_specs=pl.BlockSpec((bb, n_out_p), lambda i: (i, 0)),
        ),
        compiler_params=pltpu.CompilerParams(
            dimension_semantics=("parallel",),
            vmem_limit_bytes=vmem_limit),
    )(xp, w0, b0, w1, b1, w2, b2, ln_g, ln_b, w3, b3)

    # Strip batch / lane padding outside the kernel.
    return out_p[:B, :n_out]


def init_params(key, n_in, n_out, hidden):
    """Deterministic synthetic parameters (PyTorch-shaped, stored as [in, out])."""
    ks = jax.random.split(key, 8)

    def lin(kw, kb, fan_in, fan_out):
        w = jax.random.normal(kw, (fan_in, fan_out), jnp.float32) * 0.1
        b = jax.random.normal(kb, (1, fan_out), jnp.float32) * 0.1
        return w, b

    w0, b0 = lin(ks[0], ks[1], n_in, hidden)
    w1, b1 = lin(ks[2], ks[3], hidden, hidden)
    w2, b2 = lin(ks[4], ks[5], hidden, hidden)
    w3, b3 = lin(ks[6], ks[7], hidden, n_out)
    return {
        "w0": w0, "b0": b0,
        "w1": w1, "b1": b1,
        "w2": w2, "b2": b2,
        # LayerNorm default init: weight = 1, bias = 0
        "ln_g": jnp.ones((1, hidden), jnp.float32),
        "ln_b": jnp.zeros((1, hidden), jnp.float32),
        "w3": w3, "b3": b3,
    }


def mlp_reference(x, p):
    """Pure-JAX f32 reference mirroring the PyTorch Sequential."""
    h = jnp.maximum(x @ p["w0"] + p["b0"], 0.0)
    h = jnp.maximum(h @ p["w1"] + p["b1"], 0.0)
    h = jnp.maximum(h @ p["w2"] + p["b2"], 0.0)
    mean = jnp.mean(h, axis=-1, keepdims=True)
    var = jnp.mean(jnp.square(h - mean), axis=-1, keepdims=True)
    h = (h - mean) / jnp.sqrt(var + 1e-5) * p["ln_g"] + p["ln_b"]
    return h @ p["w3"] + p["b3"]


if __name__ == "__main__":
    # Shapes consistent with MLP(n_in=32, n_out=16, hidden=64, nlayers=2);
    # B=384 -> bb=192, a 2-step "parallel" grid with zero dead rows.
    B, n_in, hidden, n_out = 384, 32, 64, 16

    key = jax.random.PRNGKey(0)
    kx, kp = jax.random.split(key)
    x = jax.random.normal(kx, (B, n_in), jnp.float32)
    params = init_params(kp, n_in, n_out, hidden)

    ref = mlp_reference(x, params)

    # f32 path: tight check against the reference (also the v5e-friendly path).
    out_f32 = jax.block_until_ready(mlp_forward(x, params, use_bf16=False))
    assert out_f32.shape == (B, n_out)
    assert jnp.allclose(out_f32, ref, atol=1e-4, rtol=1e-4), "f32 mismatch"

    # bf16 path (default, fast on v6e/v7x): inter-layer precision is bf16,
    # MXU accumulation and LayerNorm stats are f32 -> looser tolerance.
    out_bf16 = jax.block_until_ready(mlp_forward(x, params, use_bf16=True))
    assert out_bf16.shape == (B, n_out)
    assert jnp.allclose(out_bf16, ref, atol=5e-2, rtol=5e-2), "bf16 mismatch"

    # Ragged batch: exercises bb selection + dead-row padding in the last tile
    # and the analytic variance correction under batch padding.
    xr = x[:37]
    ref_r = mlp_reference(xr, params)
    out_r = jax.block_until_ready(mlp_forward(xr, params, use_bf16=False))
    assert out_r.shape == (37, n_out)
    assert jnp.allclose(out_r, ref_r, atol=1e-4, rtol=1e-4), "ragged mismatch"

    print("KERNEL_OK")
</pallas_src>

<mosaic_0001>
module attributes {stable_mosaic.version = 11 : i64} {
  func.func @mlp_kernel(%arg0: i32, %arg1: memref<192x128xf32, #tpu.memory_space<vmem>>, %arg2: memref<128x128xf32, #tpu.memory_space<vmem>>, %arg3: memref<1x128xf32, #tpu.memory_space<vmem>>, %arg4: memref<128x128xf32, #tpu.memory_space<vmem>>, %arg5: memref<1x128xf32, #tpu.memory_space<vmem>>, %arg6: memref<128x128xf32, #tpu.memory_space<vmem>>, %arg7: memref<1x128xf32, #tpu.memory_space<vmem>>, %arg8: memref<1x128xf32, #tpu.memory_space<vmem>>, %arg9: memref<1x128xf32, #tpu.memory_space<vmem>>, %arg10: memref<128x128xf32, #tpu.memory_space<vmem>>, %arg11: memref<1x128xf32, #tpu.memory_space<vmem>>, %arg12: memref<192x128xf32, #tpu.memory_space<vmem>>) attributes {dimension_semantics = [#tpu.dimension_semantics<parallel>], iteration_bounds = array<i64: 2>, scalar_prefetch = 0 : i64, scratch_operands = 0 : i64, tpu.core_type = #tpu.core_type<tc>, window_params = [{transform_indices = @transform_0, window_bounds = array<i64: 192, 128>}, {pipeline_mode = #tpu.pipeline_mode<synchronous>, transform_indices = @transform_1, window_bounds = array<i64: 128, 128>}, {pipeline_mode = #tpu.pipeline_mode<synchronous>, transform_indices = @transform_2, window_bounds = array<i64: 1, 128>}, {pipeline_mode = #tpu.pipeline_mode<synchronous>, transform_indices = @transform_3, window_bounds = array<i64: 128, 128>}, {pipeline_mode = #tpu.pipeline_mode<synchronous>, transform_indices = @transform_4, window_bounds = array<i64: 1, 128>}, {pipeline_mode = #tpu.pipeline_mode<synchronous>, transform_indices = @transform_5, window_bounds = array<i64: 128, 128>}, {pipeline_mode = #tpu.pipeline_mode<synchronous>, transform_indices = @transform_6, window_bounds = array<i64: 1, 128>}, {pipeline_mode = #tpu.pipeline_mode<synchronous>, transform_indices = @transform_7, window_bounds = array<i64: 1, 128>}, {pipeline_mode = #tpu.pipeline_mode<synchronous>, transform_indices = @transform_8, window_bounds = array<i64: 1, 128>}, {pipeline_mode = #tpu.pipeline_mode<synchronous>, transform_indices = @transform_9, window_bounds = array<i64: 128, 128>}, {pipeline_mode = #tpu.pipeline_mode<synchronous>, transform_indices = @transform_10, window_bounds = array<i64: 1, 128>}, {transform_indices = @transform_11, window_bounds = array<i64: 192, 128>}]} {
    %c0 = arith.constant 0 : index
    %c0_0 = arith.constant 0 : index
    %0 = vector.load %arg1[%c0, %c0_0] : memref<192x128xf32, #tpu.memory_space<vmem>>, vector<192x128xf32>
    %c0_1 = arith.constant 0 : index
    %c0_2 = arith.constant 0 : index
    %1 = vector.load %arg2[%c0_1, %c0_2] : memref<128x128xf32, #tpu.memory_space<vmem>>, vector<128x128xf32>
    %cst = arith.constant dense<0.000000e+00> : vector<192x128xf32>
    %2 = tpu.matmul %0, %1, %cst {dimension_numbers = #tpu.dot_dimension_numbers<[1], [0], [0], [1], [0, 0, 1, 1], [], []>} : vector<192x128xf32>, vector<128x128xf32>, vector<192x128xf32> -> vector<192x128xf32>
    %c0_3 = arith.constant 0 : index
    %c0_4 = arith.constant 0 : index
    %3 = vector.load %arg3[%c0_3, %c0_4] : memref<1x128xf32, #tpu.memory_space<vmem>>, vector<1x128xf32>
    %4 = vector.broadcast %3 : vector<1x128xf32> to vector<192x128xf32>
    %5 = arith.addf %2, %4 : vector<192x128xf32>
    %cst_5 = arith.constant 0.000000e+00 : f32
    %6 = vector.broadcast %cst_5 : f32 to vector<192x128xf32>
    %7 = arith.maximumf %5, %6 : vector<192x128xf32>
    %c0_6 = arith.constant 0 : index
    %c0_7 = arith.constant 0 : index
    %8 = vector.load %arg4[%c0_6, %c0_7] : memref<128x128xf32, #tpu.memory_space<vmem>>, vector<128x128xf32>
    %cst_8 = arith.constant dense<0.000000e+00> : vector<192x128xf32>
    %9 = tpu.matmul %7, %8, %cst_8 {dimension_numbers = #tpu.dot_dimension_numbers<[1], [0], [0], [1], [0, 0, 1, 1], [], []>} : vector<192x128xf32>, vector<128x128xf32>, vector<192x128xf32> -> vector<192x128xf32>
    %c0_9 = arith.constant 0 : index
    %c0_10 = arith.constant 0 : index
    %10 = vector.load %arg5[%c0_9, %c0_10] : memref<1x128xf32, #tpu.memory_space<vmem>>, vector<1x128xf32>
    %11 = vector.broadcast %10 : vector<1x128xf32> to vector<192x128xf32>
    %12 = arith.addf %9, %11 : vector<192x128xf32>
    %cst_11 = arith.constant 0.000000e+00 : f32
    %13 = vector.broadcast %cst_11 : f32 to vector<192x128xf32>
    %14 = arith.maximumf %12, %13 : vector<192x128xf32>
    %c0_12 = arith.constant 0 : index
    %c0_13 = arith.constant 0 : index
    %15 = vector.load %arg6[%c0_12, %c0_13] : memref<128x128xf32, #tpu.memory_space<vmem>>, vector<128x128xf32>
    %cst_14 = arith.constant dense<0.000000e+00> : vector<192x128xf32>
    %16 = tpu.matmul %14, %15, %cst_14 {dimension_numbers = #tpu.dot_dimension_numbers<[1], [0], [0], [1], [0, 0, 1, 1], [], []>} : vector<192x128xf32>, vector<128x128xf32>, vector<192x128xf32> -> vector<192x128xf32>
    %c0_15 = arith.constant 0 : index
    %c0_16 = arith.constant 0 : index
    %17 = vector.load %arg7[%c0_15, %c0_16] : memref<1x128xf32, #tpu.memory_space<vmem>>, vector<1x128xf32>
    %18 = vector.broadcast %17 : vector<1x128xf32> to vector<192x128xf32>
    %19 = arith.addf %16, %18 : vector<192x128xf32>
    %cst_17 = arith.constant 0.000000e+00 : f32
    %20 = vector.broadcast %cst_17 : f32 to vector<192x128xf32>
    %21 = arith.maximumf %19, %20 : vector<192x128xf32>
    %cst_18 = arith.constant dense<0.000000e+00> : vector<192xf32>
    %22 = vector.multi_reduction <add>, %21, %cst_18 [1] : vector<192x128xf32> to vector<192xf32>
    %23 = vector.shape_cast %22 : vector<192xf32> to vector<192x1xf32>
    %cst_19 = arith.constant 1.562500e-02 : f32
    %24 = vector.broadcast %cst_19 : f32 to vector<192x1xf32>
    %25 = arith.mulf %23, %24 : vector<192x1xf32>
    %26 = vector.broadcast %25 : vector<192x1xf32> to vector<192x128xf32>
    %27 = arith.subf %21, %26 : vector<192x128xf32>
    %28 = arith.mulf %27, %27 : vector<192x128xf32>
    %cst_20 = arith.constant dense<0.000000e+00> : vector<192xf32>
    %29 = vector.multi_reduction <add>, %28, %cst_20 [1] : vector<192x128xf32> to vector<192xf32>
    %30 = vector.shape_cast %29 : vector<192xf32> to vector<192x1xf32>
    %cst_21 = arith.constant 1.562500e-02 : f32
    %31 = vector.broadcast %cst_21 : f32 to vector<192x1xf32>
    %32 = arith.mulf %30, %31 : vector<192x1xf32>
    %33 = arith.mulf %25, %25 : vector<192x1xf32>
    %cst_22 = arith.constant 1.000000e+00 : f32
    %34 = vector.broadcast %cst_22 : f32 to vector<192x1xf32>
    %35 = arith.mulf %34, %33 : vector<192x1xf32>
    %36 = arith.subf %32, %35 : vector<192x1xf32>
    %cst_23 = arith.constant 9.99999974E-6 : f32
    %37 = vector.broadcast %cst_23 : f32 to vector<192x1xf32>
    %38 = arith.addf %36, %37 : vector<192x1xf32>
    %39 = math.rsqrt %38 : vector<192x1xf32>
    %40 = vector.broadcast %39 : vector<192x1xf32> to vector<192x128xf32>
    %41 = arith.mulf %27, %40 : vector<192x128xf32>
    %c0_24 = arith.constant 0 : index
    %c0_25 = arith.constant 0 : index
    %42 = vector.load %arg8[%c0_24, %c0_25] : memref<1x128xf32, #tpu.memory_space<vmem>>, vector<1x128xf32>
    %43 = vector.broadcast %42 : vector<1x128xf32> to vector<192x128xf32>
    %44 = arith.mulf %41, %43 : vector<192x128xf32>
    %c0_26 = arith.constant 0 : index
    %c0_27 = arith.constant 0 : index
    %45 = vector.load %arg9[%c0_26, %c0_27] : memref<1x128xf32, #tpu.memory_space<vmem>>, vector<1x128xf32>
    %46 = vector.broadcast %45 : vector<1x128xf32> to vector<192x128xf32>
    %47 = arith.addf %44, %46 : vector<192x128xf32>
    %c0_28 = arith.constant 0 : index
    %c0_29 = arith.constant 0 : index
    %48 = vector.load %arg10[%c0_28, %c0_29] : memref<128x128xf32, #tpu.memory_space<vmem>>, vector<128x128xf32>
    %cst_30 = arith.constant dense<0.000000e+00> : vector<192x128xf32>
    %49 = tpu.matmul %47, %48, %cst_30 {dimension_numbers = #tpu.dot_dimension_numbers<[1], [0], [0], [1], [0, 0, 1, 1], [], []>} : vector<192x128xf32>, vector<128x128xf32>, vector<192x128xf32> -> vector<192x128xf32>
    %c0_31 = arith.constant 0 : index
    %c0_32 = arith.constant 0 : index
    %50 = vector.load %arg11[%c0_31, %c0_32] : memref<1x128xf32, #tpu.memory_space<vmem>>, vector<1x128xf32>
    %51 = vector.broadcast %50 : vector<1x128xf32> to vector<192x128xf32>
    %52 = arith.addf %49, %51 : vector<192x128xf32>
    %c0_33 = arith.constant 0 : index
    %c0_34 = arith.constant 0 : index
    %53 = vector.load %arg12[%c0_33, %c0_34] : memref<192x128xf32, #tpu.memory_space<vmem>>, vector<192x128xf32>
    tpu.vector_store %arg12[%c0_33, %c0_34], %52 {strides = array<i32>} : memref<192x128xf32, #tpu.memory_space<vmem>>, vector<192x128xf32>,
    return
  }
  func.func @transform_0(%arg0: i32) -> (i32, i32) {
    %c0_i32 = arith.constant 0 : i32
    %c0_i32_0 = arith.constant 0 : i32
    return %arg0, %c0_i32 : i32, i32
  }
  func.func @transform_1(%arg0: i32) -> (i32, i32) {
    %c0_i32 = arith.constant 0 : i32
    %c0_i32_0 = arith.constant 0 : i32
    %c0_i32_1 = arith.constant 0 : i32
    return %c0_i32, %c0_i32_0 : i32, i32
  }
  func.func @transform_2(%arg0: i32) -> (i32, i32) {
    %c0_i32 = arith.constant 0 : i32
    %c0_i32_0 = arith.constant 0 : i32
    %c0_i32_1 = arith.constant 0 : i32
    return %c0_i32, %c0_i32_0 : i32, i32
  }
  func.func @transform_3(%arg0: i32) -> (i32, i32) {
    %c0_i32 = arith.constant 0 : i32
    %c0_i32_0 = arith.constant 0 : i32
    %c0_i32_1 = arith.constant 0 : i32
    return %c0_i32, %c0_i32_0 : i32, i32
  }
  func.func @transform_4(%arg0: i32) -> (i32, i32) {
    %c0_i32 = arith.constant 0 : i32
    %c0_i32_0 = arith.constant 0 : i32
    %c0_i32_1 = arith.constant 0 : i32
    return %c0_i32, %c0_i32_0 : i32, i32
  }
  func.func @transform_5(%arg0: i32) -> (i32, i32) {
    %c0_i32 = arith.constant 0 : i32
    %c0_i32_0 = arith.constant 0 : i32
    %c0_i32_1 = arith.constant 0 : i32
    return %c0_i32, %c0_i32_0 : i32, i32
  }
  func.func @transform_6(%arg0: i32) -> (i32, i32) {
    %c0_i32 = arith.constant 0 : i32
    %c0_i32_0 = arith.constant 0 : i32
    %c0_i32_1 = arith.constant 0 : i32
    return %c0_i32, %c0_i32_0 : i32, i32
  }
  func.func @transform_7(%arg0: i32) -> (i32, i32) {
    %c0_i32 = arith.constant 0 : i32
    %c0_i32_0 = arith.constant 0 : i32
    %c0_i32_1 = arith.constant 0 : i32
    return %c0_i32, %c0_i32_0 : i32, i32
  }
  func.func @transform_8(%arg0: i32) -> (i32, i32) {
    %c0_i32 = arith.constant 0 : i32
    %c0_i32_0 = arith.constant 0 : i32
    %c0_i32_1 = arith.constant 0 : i32
    return %c0_i32, %c0_i32_0 : i32, i32
  }
  func.func @transform_9(%arg0: i32) -> (i32, i32) {
    %c0_i32 = arith.constant 0 : i32
    %c0_i32_0 = arith.constant 0 : i32
    %c0_i32_1 = arith.constant 0 : i32
    return %c0_i32, %c0_i32_0 : i32, i32
  }
  func.func @transform_10(%arg0: i32) -> (i32, i32) {
    %c0_i32 = arith.constant 0 : i32
    %c0_i32_0 = arith.constant 0 : i32
    %c0_i32_1 = arith.constant 0 : i32
    return %c0_i32, %c0_i32_0 : i32, i32
  }
  func.func @transform_11(%arg0: i32) -> (i32, i32) {
    %c0_i32 = arith.constant 0 : i32
    %c0_i32_0 = arith.constant 0 : i32
    return %arg0, %c0_i32 : i32, i32
  }
}

</mosaic_0001>

<bundles_post_ra>
// kernel: tpu_custom_call.1
= control target key start
LH: loop header
LB: loop body
LE: loop exit
PB: predicated region body
PF: predicated region fallthrough
CT: control target
= control target key end

     0   :  { %s3651_s0 = inlined_call_operand.hbm [shape: f32[384,128], index: 0, kind: input, shape index: {}]   ;;  %s3652_s1 = inlined_call_operand.hbm [shape: f32[128,128], index: 1, kind: input, shape index: {}]   ;;  %s3653_s2 = inlined_call_operand.vmem [shape: f32[1,128], index: 2, kind: input, shape index: {}]   ;;  %s3654_s3 = inlined_call_operand.hbm [shape: f32[128,128], index: 3, kind: input, shape index: {}]   ;;  %s3655_s4 = inlined_call_operand.vmem [shape: f32[1,128], index: 4, kind: input, shape index: {}]   ;;  %s3656_s5 = inlined_call_operand.hbm [shape: f32[128,128], index: 5, kind: input, shape index: {}]   ;;  %s3657_s6 = inlined_call_operand.vmem [shape: f32[1,128], index: 6, kind: input, shape index: {}]   ;;  %s3658_s7 = inlined_call_operand.vmem [shape: f32[1,128], index: 7, kind: input, shape index: {}]   ;;  %s3659_s8 = inlined_call_operand.vmem [shape: f32[1,128], index: 8, kind: input, shape index: {}]   ;;  %s3660_s9 = inlined_call_operand.hbm [shape: f32[128,128], index: 9, kind: input, shape index: {}]   ;;  %s3661_s10 = inlined_call_operand.vmem [shape: f32[1,128], index: 10, kind: input, shape index: {}]   ;;  %s3662_s11 = inlined_call_operand.hbm [shape: f32[384,128], index: 11, kind: output, shape index: {}]  }
   0x1   :  { %3669 = sst [smem:[#allocation17_spill]] %s3652_s1 }
   0x2   :  { %3670 = sst [smem:[#allocation18_spill]] %s3654_s3 }
   0x3   :  { %3671 = sst [smem:[#allocation19_spill]] %s3656_s5 }
   0x4   :  { %3672 = sst [smem:[#allocation20_spill]] %s3660_s9 }
   0x5   :  { %16 = vsyncpa [#allocation3], 0 }
   0x6   :  { %18 = vsyncpa [#allocation3 + $0x1], 0 }
   0x7   :  { %19 = vsyncpa [#allocation6], 0 }
   0x8   :  { %20 = vsyncpa [#allocation9], 0 }
   0x9   :  { %21 = vsyncpa [#allocation4], 0 }
   0xa   :  { %23 = vsyncpa [#allocation4 + $0x1], 0  ;;  %s2789_s17 = smov 0   ;;  %s2791_s18 = smov 0  }
   0xb   :  { %s2793_s19 = smov 0   ;;  %s2795_s20 = smov 0  }
   0xc LB: > { %s2810_s21 = sadd.s32 4294967295, %s2717_s20   ;;  %s1916_s22 = sadd.s32 4294967294, %s2717_s20   ;;  %s2717_s20 = sphi %s2795_s20, %s3699_s20   ;;  %s2713_s19 = sphi %s2793_s19, %s3698_s19   ;;  %s2709_s18 = sphi %s2791_s18, %s3697_s18   ;;  %s2705_s17 = sphi %s2789_s17, %s3696_s17  }
   0xd   : > { %p49_p0 = scmp.ne.s32.totalorder %s2709_s18, %s2705_s17  ;;  %p3663_p1 = scmp.eq.s32.totalorder %s2810_s21, 0 }
   0xe   : > { %p283_p2 = scmp.eq.s32.totalorder %s2810_s21, 1  ;;  %p289_p3 = scmp.eq.s32.totalorder %s1916_s22, 1 }
   0xf   : > { %p2819_p4 = por %p3663_p1, %p49_p0  ;;  %p1917_p5 = scmp.ge.s32.totalorder %s2717_s20, 1 }
  0x10   : > { %p2824_p6 = por %p289_p3, %p49_p0  ;;  %p296_p7 = scmp.lt.s32.totalorder %s2717_s20, 3 }
  0x11   : > { %s3673_s23 = scalar_select %p2819_p4, 1, 0 }
  0x12   : > { %s3674_s24 = scalar_select %p2824_p6, 1, 0 }
  0x13   : > { %p2829_p8 = pnand %p1917_p5, %p296_p7  ;;  %s2719_s26 = smov [#allocation5]  }
  0x14   : > { %s308_s27 = sshll.u32 %s2719_s26, 4  ;;  %s2720_s29 = smov [#allocation8]   ;;  %s309_s27 = int_to_ptr.vmem [resolvable:$true] %s308_s27 }
  0x15   : > { %s3675_s25 = scalar_select %p2829_p8, 1, 0 }
  0x16   : > { %p2394_p9 = pneg %p2829_p8  ;;  %s340_s30 = sshll.u32 %s2720_s29, 4  ;;  %s341_s30 = int_to_ptr.vmem [resolvable:$true] %s340_s30 }
  0x17   : > { %s2721_s12 = smov [#allocation7]   ;;  %s2524_s14 = scalar_lea.vmem %s309_s27, 2048 }
  0x18   : > { %p2838_p11 = pnand %p2394_p9, %p3663_p1  ;;  %s324_s13 = sshll.u32 %s2721_s12, 4  ;;  %s325_s13 = int_to_ptr.vmem [resolvable:$true] %s324_s13 }
  0x19   : > { %p2525_p13 = scmp.ne.s32.totalorder %s309_s27, %s2524_s14  ;;  %p2532_p5 = scmp.lt.s32.totalorder %s309_s27, %s309_s27 }
  0x1a   : > { %p2515_p12 = pneg %p2838_p11  ;;  %p2533_p7 = scmp.lt.s32.totalorder %s2524_s14, %s2524_s14 }
  0x1c   : > { %p2527_p0 = pnand %p2525_p13, %p2515_p12  ;;  %p2534_p9 = por %p2533_p7, %p2532_p5 }
  0x1e   : > { %p2528_p3 = pneg %p2527_p0 }
  0x20   : > { %p2535_p10 = pnand %p2534_p9, %p2528_p3 }
  0x22   : > { %2538 = shalt.err (!%p2535_p10)
}
  0x23   : > { %s3664_s15 = smov 128   ;;  %s3665_s16 = smov 8  }
  0x24   : > { %s3677_s1 = sld [smem:[#allocation17_spill]]  ;;  %s2550_s29 = scalar_lea.vmem %s341_s30, 2048 }
  0x25   : > { %p2551_p13 = scmp.ne.s32.totalorder %s341_s30, %s2550_s29  ;;  %p2558_p3 = scmp.lt.s32.totalorder %s341_s30, %s341_s30 }
  0x26   : > { %p2559_p10 = scmp.lt.s32.totalorder %s2550_s29, %s2550_s29 }
  0x27   : > { %p2553_p0 = pnand %p2551_p13, %p2515_p12 }
  0x28   : > { %p2560_p7 = por %p2559_p10, %p2558_p3 }
  0x29   : > { %p2554_p5 = pneg %p2553_p0 }
  0x2a   : > { %2397 = dma.hbm_to_vmem [thread:$0]  (!%p2838_p11), %s3677_s1, 2048, %s309_s27, [#allocation6], %s3664_s15, %s3664_s15, %s3665_s16  }
  0x2b   : > { %p2561_p9 = pnand %p2560_p7, %p2554_p5 }
  0x2d   : > { %2564 = shalt.err (!%p2561_p9)
}
  0x2e   : > { %s3678_s5 = sld [smem:[#allocation19_spill]]  ;;  %s2576_s27 = scalar_lea.vmem %s325_s13, 2048 }
  0x2f   : > { %p2577_p1 = scmp.ne.s32.totalorder %s325_s13, %s2576_s27  ;;  %p2584_p3 = scmp.lt.s32.totalorder %s325_s13, %s325_s13 }
  0x30   : > { %p2585_p5 = scmp.lt.s32.totalorder %s2576_s27, %s2576_s27 }
  0x31   : > { %p2579_p13 = pnand %p2577_p1, %p2515_p12 }
  0x32   : > { %p2586_p10 = por %p2585_p5, %p2584_p3 }
  0x33   : > { %p2580_p0 = pneg %p2579_p13 }
  0x34   : > { %2403 = dma.hbm_to_vmem [thread:$0]  (!%p2838_p11), %s3678_s5, 2048, %s341_s30, [#allocation9], %s3664_s15, %s3664_s15, %s3665_s16  }
  0x35   : > { %p2587_p7 = pnand %p2586_p10, %p2580_p0 }
  0x37   : > { %2590 = shalt.err (!%p2587_p7)
}
  0x38   : > { %s3679_s3 = sld [smem:[#allocation18_spill]]  ;;  %s2724_s30 = smov [#allocation10]  }
  0x39   : > { %s362_s29 = sshll.u32 %s2724_s30, 4  ;;  %s363_s29 = int_to_ptr.vmem [resolvable:$true] %s362_s29 }
  0x3a   : > { %s2602_s12 = scalar_lea.vmem %s363_s29, 2048  ;;  %p2610_p0 = scmp.lt.s32.totalorder %s363_s29, %s363_s29 }
  0x3b   : > { %p2603_p1 = scmp.ne.s32.totalorder %s363_s29, %s2602_s12  ;;  %p2611_p3 = scmp.lt.s32.totalorder %s2602_s12, %s2602_s12 }
  0x3d   : > { %p2605_p9 = pnand %p2603_p1, %p2515_p12  ;;  %p2612_p5 = por %p2611_p3, %p2610_p0 }
  0x3e   : > { %2400 = dma.hbm_to_vmem [thread:$0]  (!%p2838_p11), %s3679_s3, 2048, %s325_s13, [#allocation6], %s3664_s15, %s3664_s15, %s3665_s16  }
  0x3f   : > { %p2606_p13 = pneg %p2605_p9 }
  0x41   : > { %p2613_p10 = pnand %p2612_p5, %p2606_p13 }
  0x43   : > { %2616 = shalt.err (!%p2613_p10)
}
  0x44   : > { %s3680_s9 = sld [smem:[#allocation20_spill]]  ;;  %s2889_s27 = sadd.s32 1, %s2717_s20  }
  0x45   : > { %s36_s28 = sadd.s32 1, %s2713_s19  ;;  %s33_s22 = ssub.s32 %s2717_s20, %s2889_s27 }
  0x46   : > { %p43_p12 = scmp.ne.s32.totalorder %s2713_s19, %s2709_s18  ;;  %p34_p7 = scmp.eq.s32.totalorder %s33_s22, 0 }
  0x47   : > { %p44_p1 = scmp.eq.s32.totalorder %s2717_s20, 0  ;;  %p2419_p13 = scmp.lt.s32.totalorder %s2717_s20, 2 }
  0x48   : > { %p2899_p9 = por %p283_p2, %p43_p12  ;;  %s379_s12 = sand.u32 1, %s2713_s19  }
  0x49   : > { %s2905_s30 = scalar_select %p34_p7, %s2713_s19, %s36_s28  }
  0x4a   : > { %2406 = dma.hbm_to_vmem [thread:$0]  (!%p2838_p11), %s3680_s9, 2048, %s363_s29, [#allocation9], %s3664_s15, %s3664_s15, %s3665_s16  }
  0x4b   : > { %s3681_s26 = scalar_select %p2899_p9, 1, 0 }
  0x4c   : > { %3682 = sst [smem:[#allocation16_spill]] %s2905_s30  ;;  %p45_p0 = por %p44_p1, %p43_p12 }
  0x4d   : > { %s2372_s13 = smul.u32 192, %s379_s12  ;;  %s2920_s3 = scalar_lea.sflag [#allocation3], %s379_s12 }
  0x4e   : > { %s1938_s29 = smul.u32 3072, %s2717_s20  ;;  %p2909_p11 = pnand %p2419_p13, %p45_p0 }
  0x4f   : > { %s383_s1 = scalar_lea.vmem [#allocation2], %s2372_s13  ;;  %s2622_s16 = scalar_lea.hbm %s3651_s0, 6144 }
  0x50   : > { %s2916_s22 = scalar_lea.hbm %s3651_s0, %s1938_s29  ;;  %s390_s28 = sshll.u32 %s383_s1, 4  ;;  %s2918_s28 = int_to_ptr.vmem [resolvable:$true] %s390_s28 }
  0x51   : > { %s2617_s5 = scalar_lea.hbm %s2916_s22, 3072  ;;  %p2619_p3 = pneg %p2909_p11 }
  0x52   : > { %p2618_p2 = scmp.ne.s32.totalorder %s2916_s22, %s2617_s5  ;;  %p2623_p12 = scmp.lt.s32.totalorder %s2916_s22, %s3651_s0 }
  0x53   : > { %p2624_p7 = scmp.lt.s32.totalorder %s2622_s16, %s2617_s5 }
  0x54   : > { %p2620_p5 = pnand %p2619_p3, %p2618_p2 }
  0x55   : > { %p2625_p1 = por %p2624_p7, %p2623_p12 }
  0x56   : > { %p2621_p10 = pneg %p2620_p5 }
  0x58   : > { %p2626_p13 = pnand %p2625_p1, %p2621_p10 }
  0x5a   : > { %2629 = shalt.err (!%p2626_p13)
}
  0x5b   : > { %s2630_s1 = scalar_lea.vmem %s2918_s28, 3072  ;;  %s2725_s12 = smov [#allocation2]  }
  0x5c   : > { %p2631_p0 = scmp.ne.s32.totalorder %s2918_s28, %s2630_s1  ;;  %s2635_s13 = sshll.u32 %s2725_s12, 4  ;;  %s2636_s13 = int_to_ptr.vmem [resolvable:$false] %s2635_s13 }
  0x5d   : > { %s2637_s9 = scalar_lea.vmem %s2636_s13, 6144  ;;  %p2638_p5 = scmp.lt.s32.totalorder %s2918_s28, %s2636_s13 }
  0x5e   : > { %p2633_p6 = pnand %p2631_p0, %p2619_p3  ;;  %p2639_p9 = scmp.lt.s32.totalorder %s2637_s9, %s2630_s1 }
  0x60   : > { %p2634_p2 = pneg %p2633_p6  ;;  %p2640_p4 = por %p2639_p9, %p2638_p5 }
  0x62   : > { %p2641_p8 = pnand %p2640_p4, %p2634_p2 }
  0x64   : > { %2644 = shalt.err (!%p2641_p8)
}
  0x65   : > { %s3684_s5 = smov 8   ;;  %s3685_s30 = smov 128  }
  0x66   : > { %2410 = dma.hbm_to_vmem [thread:$0]  (!%p2909_p11), %s2916_s22, 3072, %s2918_s28, %s2920_s3, %s3685_s30, %s3685_s30, %s3684_s5  }
  0x67   : > { %p3686_p6 = scmp.ne.s32.totalorder %s3675_s25, 0 }
  0x68   : > { %s2947_s15 = sand.u32 (!%p3686_p6), 1, %s2709_s18   ;;  %p3687_p4 = scmp.ne.s32.totalorder (!%p3686_p6), %s3673_s23, 0 }
  0x69   : > { %402 = sbr.rel (%p3686_p6) target bundleno = 1317 (0x525), region = 64  ;;  %s405_s29 = scalar_lea.sflag (!%p3686_p6), [#allocation3], %s2947_s15 }
  0x6a   : > { %s2373_s16 = smul.u32 (!%p3686_p6), 192, %s2947_s15 }
  0x6c   : > { %s2953_s14 = scalar_lea.vmem (!%p3686_p6), [#allocation2], %s2373_s16 }
  0x6e   : > { %2688 = dma.done.wait (%p3687_p4), %s405_s29, 3072  }
  0x6f   : > { %2690 = vsyncadd (%p3687_p4), %s405_s29, 4294964224  ;;  %p3688_p8 = scmp.eq.s32.totalorder %s2810_s21, 0 }
  0x71   : > { %2692 = dma.done.wait (%p3688_p8), [#allocation6], 4096   ;;  %p3689_p9 = pmov %p3688_p8 }
  0x72   : > { %p3690_p11 = pmov %p3688_p8 }
  0x73   : > { %2694 = vsyncadd (%p3689_p9), [#allocation6], 4294963200 }
  0x74   : > { %2696 = dma.done.wait (%p3690_p11), [#allocation9], 4096   ;;  %p3691_p3 = pmov %p3688_p8 }
  0x75   : > { %v504_v0 = vld [vmem:[#allocation5 + $0x78] sm:$0xff]  ;;  %v503_v1 = vld [vmem:[#allocation5 + $0x70] sm:$0xff]  ;;  %v502_v2 = vld [vmem:[#allocation5 + $0x68] sm:$0xff]  ;;  %p3692_p12 = scmp.ne.s32.totalorder %s3681_s26, 0  ;;  %s2726_s1 = smov [#allocation11]  }
  0x76   : > { %2698 = vsyncadd (%p3691_p3), [#allocation9], 4294963200  ;;  %2100 = vmatprep.subr.mxu0 %v504_v0  ;;  %v501_v3 = vld [vmem:[#allocation5 + $0x60] sm:$0xff]  ;;  %v500_v5 = vld [vmem:[#allocation5 + $0x58] sm:$0xff]  ;;  %s2649_s12 = sshll.u32 %s2726_s1, 4  ;;  %s2650_s12 = int_to_ptr.vmem [resolvable:$false] %s2649_s12 }
  0x77   : > { %2101 = vmatpush3.msra.mxu0 %v504_v0  ;;  %v465_v4 = vld [vmem:[%s2953_s14] sm:$0xff]  ;;  %v499_v6 = vld [vmem:[#allocation5 + $0x50] sm:$0xff]  ;;  %v498_v7 = vld [vmem:[#allocation5 + $0x48] sm:$0xff]  ;;  %s2651_s13 = scalar_lea.vmem %s2650_s12, 6144 }
  0x78   : > { %2102 = vmatprep.subr.mxu0 %v503_v1  ;;  %2132 = vmatprep.mubr.f32.mxu0 %v465_v4  ;;  %v497_v8 = vld [vmem:[#allocation5 + $0x40] sm:$0xff]  ;;  %v736_v9 = vld [vmem:[#allocation7 + $0x78] sm:$0xff]  ;;  %v735_v10 = vld [vmem:[#allocation7 + $0x70] sm:$0xff] }
  0x79   : > { %2103 = vmatpush3.msra.mxu0 %v503_v1  ;;  %v496_v11 = vld [vmem:[#allocation5 + $0x38] sm:$0xff]  ;;  %2168 = vmatprep.subr.mxu1 %v736_v9  ;;  %v734_v12 = vld [vmem:[#allocation7 + $0x68] sm:$0xff]  ;;  %v495_v13 = vld [vmem:[#allocation5 + $0x30] sm:$0xff] }
  0x7a   : > { %2104 = vmatprep.subr.mxu0 %v502_v2  ;;  %2169 = vmatpush3.msra.mxu1 %v736_v9  ;;  %v733_v14 = vld [vmem:[#allocation7 + $0x60] sm:$0xff]  ;;  %v494_v15 = vld [vmem:[#allocation5 + $0x28] sm:$0xff]  ;;  %v732_v16 = vld [vmem:[#allocation7 + $0x58] sm:$0xff] }
  0x7b   : > { %2105 = vmatpush3.msra.mxu0 %v502_v2  ;;  %2170 = vmatprep.subr.mxu1 %v735_v10  ;;  %v493_v17 = vld [vmem:[#allocation5 + $0x20] sm:$0xff]  ;;  %v731_v18 = vld [vmem:[#allocation7 + $0x50] sm:$0xff]  ;;  %v492_v19 = vld [vmem:[#allocation5 + $0x18] sm:$0xff] }
  0x7c   : > { %2106 = vmatprep.subr.mxu0 %v501_v3  ;;  %2171 = vmatpush3.msra.mxu1 %v735_v10  ;;  %v730_v20 = vld [vmem:[#allocation7 + $0x48] sm:$0xff]  ;;  %v491_v21 = vld [vmem:[#allocation5 + $0x10] sm:$0xff]  ;;  %v729_v22 = vld [vmem:[#allocation7 + $0x40] sm:$0xff] }
  0x7d   : > { %2107 = vmatpush3.msra.mxu0 %v501_v3  ;;  %2172 = vmatprep.subr.mxu1 %v734_v12  ;;  %v490_v23 = vld [vmem:[#allocation5 + $0x8] sm:$0xff]  ;;  %v728_v24 = vld [vmem:[#allocation7 + $0x38] sm:$0xff]  ;;  %v489_v25 = vld [vmem:[#allocation5] sm:$0xff] }
  0x7e   : > { %2108 = vmatprep.subr.mxu0 %v500_v5  ;;  %2173 = vmatpush3.msra.mxu1 %v734_v12  ;;  %v727_v26 = vld [vmem:[#allocation7 + $0x30] sm:$0xff]  ;;  %v466_v27 = vld [vmem:[%s2953_s14 + $0x8] sm:$0xff]  ;;  %v725_v30 = vld [vmem:[#allocation7 + $0x20] sm:$0xff] }
  0x7f   : > { %2109 = vmatpush3.msra.mxu0 %v500_v5  ;;  %2174 = vmatprep.subr.mxu1 %v733_v14  ;;  %v467_v28 = vld [vmem:[%s2953_s14 + $0x10] sm:$0xff]  ;;  %v726_v29 = vld [vmem:[#allocation7 + $0x28] sm:$0xff]  ;;  %v468_v31 = vld [vmem:[%s2953_s14 + $0x18] sm:$0xff] }
  0x80   : > { %2110 = vmatprep.subr.mxu0 %v499_v6  ;;  %2175 = vmatpush3.msra.mxu1 %v733_v14  ;;  %v469_v32 = vld [vmem:[%s2953_s14 + $0x20] sm:$0xff]  ;;  %v470_v33 = vld [vmem:[%s2953_s14 + $0x28] sm:$0xff]  ;;  %v471_v34 = vld [vmem:[%s2953_s14 + $0x30] sm:$0xff] }
  0x81   : > { %2111 = vmatpush3.msra.mxu0 %v499_v6  ;;  %2176 = vmatprep.subr.mxu1 %v732_v16  ;;  %v472_v35 = vld [vmem:[%s2953_s14 + $0x38] sm:$0xff]  ;;  %v473_v36 = vld [vmem:[%s2953_s14 + $0x40] sm:$0xff]  ;;  %v474_v37 = vld [vmem:[%s2953_s14 + $0x48] sm:$0xff] }
  0x82   : > { %2112 = vmatprep.subr.mxu0 %v498_v7  ;;  %2177 = vmatpush3.msra.mxu1 %v732_v16  ;;  %v475_v38 = vld [vmem:[%s2953_s14 + $0x50] sm:$0xff]  ;;  %v476_v39 = vld [vmem:[%s2953_s14 + $0x58] sm:$0xff]  ;;  %v477_v40 = vld [vmem:[%s2953_s14 + $0x60] sm:$0xff] }
  0x83   : > { %2113 = vmatpush3.msra.mxu0 %v498_v7  ;;  %2178 = vmatprep.subr.mxu1 %v731_v18  ;;  %v478_v41 = vld [vmem:[%s2953_s14 + $0x68] sm:$0xff]  ;;  %v479_v42 = vld [vmem:[%s2953_s14 + $0x70] sm:$0xff]  ;;  %v480_v43 = vld [vmem:[%s2953_s14 + $0x78] sm:$0xff] }
  0x84   : > { %2114 = vmatprep.subr.mxu0 %v497_v8  ;;  %2179 = vmatpush3.msra.mxu1 %v731_v18  ;;  %v481_v44 = vld [vmem:[%s2953_s14 + $0x80] sm:$0xff]  ;;  %v482_v45 = vld [vmem:[%s2953_s14 + $0x88] sm:$0xff]  ;;  %v483_v46 = vld [vmem:[%s2953_s14 + $0x90] sm:$0xff] }
  0x85   : > { %2115 = vmatpush3.msra.mxu0 %v497_v8  ;;  %2180 = vmatprep.subr.mxu1 %v730_v20  ;;  %v484_v47 = vld [vmem:[%s2953_s14 + $0x98] sm:$0xff]  ;;  %v485_v48 = vld [vmem:[%s2953_s14 + $0xa0] sm:$0xff]  ;;  %v486_v49 = vld [vmem:[%s2953_s14 + $0xa8] sm:$0xff] }
  0x86   : > { %2116 = vmatprep.subr.mxu0 %v496_v11  ;;  %2181 = vmatpush3.msra.mxu1 %v730_v20  ;;  %v487_v50 = vld [vmem:[%s2953_s14 + $0xb0] sm:$0xff]  ;;  %v488_v51 = vld [vmem:[%s2953_s14 + $0xb8] sm:$0xff]  ;;  %v722_v54 = vld [vmem:[#allocation7 + $0x8] sm:$0xff]  ;;  %s3552_s14 = scalar_lea.vmem [#allocation11], %s2373_s16  ;;  %s1939_s16 = smul.u32 3072, %s2810_s21 }
  0x87   : > { %2117 = vmatpush3.msra.mxu0 %v496_v11  ;;  %2182 = vmatprep.subr.mxu1 %v729_v22  ;;  %v724_v52 = vld [vmem:[#allocation7 + $0x18] sm:$0xff]  ;;  %v723_v53 = vld [vmem:[#allocation7 + $0x10] sm:$0xff]  ;;  %v721_v55 = vld [vmem:[#allocation7] sm:$0xff]  ;;  %s1805_s3 = sshll.u32 %s3552_s14, 4  ;;  %s1792_s21 = scalar_lea.sflag [#allocation4], %s2947_s15  ;;  %s3605_s3 = int_to_ptr.vmem [resolvable:$true] %s1805_s3 }
  0x88   : > { %2118 = vmatprep.subr.mxu0 %v495_v13  ;;  %2183 = vmatpush3.msra.mxu1 %v729_v22  ;;  %v968_v56 = vld [vmem:[#allocation8 + $0x78] sm:$0xff]  ;;  %v967_v57 = vld [vmem:[#allocation8 + $0x70] sm:$0xff]  ;;  %v966_v58 = vld [vmem:[#allocation8 + $0x68] sm:$0xff]  ;;  %s3603_s22 = scalar_lea.hbm %s3662_s11, %s1939_s16  ;;  %s2645_s28 = scalar_lea.vmem %s3605_s3, 3072 }
  0x89   : > { %2119 = vmatpush3.msra.mxu0 %v495_v13  ;;  %2184 = vmatprep.subr.mxu1 %v728_v24  ;;  %v965_v59 = vld [vmem:[#allocation8 + $0x60] sm:$0xff]  ;;  %v964_v60 = vld [vmem:[#allocation8 + $0x58] sm:$0xff]  ;;  %v963_v61 = vld [vmem:[#allocation8 + $0x50] sm:$0xff]  ;;  %p2646_p10 = scmp.ne.s32.totalorder %s3605_s3, %s2645_s28  ;;  %p2652_p13 = scmp.lt.s32.totalorder %s3605_s3, %s2650_s12 }
  0x8a   : > { %2120 = vmatprep.subr.mxu0 %v494_v15  ;;  %2185 = vmatpush3.msra.mxu1 %v728_v24  ;;  %v962_v62 = vld [vmem:[#allocation8 + $0x48] sm:$0xff]  ;;  %v961_v63 = vld [vmem:[#allocation8 + $0x40] sm:$0xff]  ;;  %v960_v0 = vld [vmem:[#allocation8 + $0x38] sm:$0xff]  ;;  %p2653_p0 = scmp.lt.s32.totalorder %s2651_s13, %s2645_s28 }
  0x8b   : > { %2121 = vmatpush3.msra.mxu0 %v494_v15  ;;  %2186 = vmatprep.subr.mxu1 %v727_v26  ;;  %v959_v1 = vld [vmem:[#allocation8 + $0x30] sm:$0xff]  ;;  %v958_v2 = vld [vmem:[#allocation8 + $0x28] sm:$0xff]  ;;  %v957_v3 = vld [vmem:[#allocation8 + $0x20] sm:$0xff]  ;;  %p2647_p7 = pnand %p2646_p10, %p3692_p12 }
  0x8c   : > { %2122 = vmatprep.subr.mxu0 %v493_v17  ;;  %2187 = vmatpush3.msra.mxu1 %v727_v26  ;;  %v956_v4 = vld [vmem:[#allocation8 + $0x18] sm:$0xff]  ;;  %v955_v5 = vld [vmem:[#allocation8 + $0x10] sm:$0xff]  ;;  %v2994_v6 = vld [vmem:[%s3653_s2] ss:$0 sm:$0xff]  ;;  %p2654_p2 = por %p2653_p0, %p2652_p13 }
  0x8d   : > { %2123 = vmatpush3.msra.mxu0 %v493_v17  ;;  %2188 = vmatprep.subr.mxu1 %v726_v29  ;;  %p2648_p1 = pneg %p2647_p7 }
  0x8e   : > { %2124 = vmatprep.subr.mxu0 %v492_v19  ;;  %2189 = vmatpush3.msra.mxu1 %v726_v29 }
  0x8f   : > { %2125 = vmatpush3.msra.mxu0 %v492_v19  ;;  %2190 = vmatprep.subr.mxu1 %v725_v30  ;;  %p2655_p5 = pnand %p2654_p2, %p2648_p1 }
  0x90   : > { %2126 = vmatprep.subr.mxu0 %v491_v21  ;;  %2191 = vmatpush3.msra.mxu1 %v725_v30 }
  0x91   : > { %2127 = vmatpush3.msra.mxu0 %v491_v21  ;;  %2192 = vmatprep.subr.mxu1 %v724_v52 }
  0x92   : > { %2128 = vmatprep.subr.mxu0 %v490_v23  ;;  %2193 = vmatpush3.msra.mxu1 %v724_v52 }
  0x93   : > { %2129 = vmatpush3.msra.mxu0 %v490_v23  ;;  %2194 = vmatprep.subr.mxu1 %v723_v53 }
  0x94   : > { %2130 = vmatprep.subr.mxu0 %v489_v25  ;;  %2195 = vmatpush3.msra.mxu1 %v723_v53 }
  0x95   : > { %2131 = vmatpush3.msra.mxu0 %v489_v25  ;;  %2196 = vmatprep.subr.mxu1 %v722_v54 }
  0x96   : > { %2133 = vmatmul.mubr.f32.vlgmr.msra.gmra.mxu0 %v466_v27  ;;  %2197 = vmatpush3.msra.mxu1 %v722_v54 }
  0x97   : > { %2135 = vmatprep.mubr.f32.mxu0 %v467_v28  ;;  %2198 = vmatprep.subr.mxu1 %v721_v55 }
  0x98   : > { %2199 = vmatpush3.msra.mxu1 %v721_v55  ;;  %2236 = vmatprep.subr.mxu0 %v968_v56 }
  0x99   : > { %2237 = vmatpush3.msra.mxu0 %v968_v56 }
  0x9a   : > { %2136 = vmatmul.mubr.f32.gmra.mxu0 %v468_v31  ;;  %2238 = vmatprep.subr.mxu0 %v967_v57 }
  0x9b   : > { %2138 = vmatprep.mubr.f32.mxu0 %v469_v32  ;;  %2239 = vmatpush3.msra.mxu0 %v967_v57 }
  0x9c   : > { %2240 = vmatprep.subr.mxu0 %v966_v58 }
  0x9d   : > { %2241 = vmatpush3.msra.mxu0 %v966_v58 }
  0x9e   : > { %2139 = vmatmul.mubr.f32.gmra.mxu0 %v470_v33  ;;  %2242 = vmatprep.subr.mxu0 %v965_v59 }
  0x9f   : > { %2141 = vmatprep.mubr.f32.mxu0 %v471_v34  ;;  %2243 = vmatpush3.msra.mxu0 %v965_v59 }
  0xa0   : > { %2244 = vmatprep.subr.mxu0 %v964_v60 }
  0xa1   : > { %2245 = vmatpush3.msra.mxu0 %v964_v60 }
  0xa2   : > { %2142 = vmatmul.mubr.f32.gmra.mxu0 %v472_v35  ;;  %2246 = vmatprep.subr.mxu0 %v963_v61 }
  0xa3   : > { %2144 = vmatprep.mubr.f32.mxu0 %v473_v36  ;;  %2247 = vmatpush3.msra.mxu0 %v963_v61 }
  0xa4   : > { %2248 = vmatprep.subr.mxu0 %v962_v62 }
  0xa5   : > { %2249 = vmatpush3.msra.mxu0 %v962_v62 }
  0xa6   : > { %2145 = vmatmul.mubr.f32.gmra.mxu0 %v474_v37  ;;  %2250 = vmatprep.subr.mxu0 %v961_v63 }
  0xa7   : > { %2147 = vmatprep.mubr.f32.mxu0 %v475_v38  ;;  %2251 = vmatpush3.msra.mxu0 %v961_v63 }
  0xa8   : > { %2252 = vmatprep.subr.mxu0 %v960_v0 }
  0xa9   : > { %2253 = vmatpush3.msra.mxu0 %v960_v0 }
  0xaa   : > { %2148 = vmatmul.mubr.f32.gmra.mxu0 %v476_v39  ;;  %2254 = vmatprep.subr.mxu0 %v959_v1 }
  0xab   : > { %2150 = vmatprep.mubr.f32.mxu0 %v477_v40  ;;  %2255 = vmatpush3.msra.mxu0 %v959_v1 }
  0xac   : > { %2256 = vmatprep.subr.mxu0 %v958_v2 }
  0xad   : > { %2257 = vmatpush3.msra.mxu0 %v958_v2 }
  0xae   : > { %2151 = vmatmul.mubr.f32.gmra.mxu0 %v478_v41  ;;  %2258 = vmatprep.subr.mxu0 %v957_v3 }
  0xaf   : > { %2153 = vmatprep.mubr.f32.mxu0 %v479_v42  ;;  %2259 = vmatpush3.msra.mxu0 %v957_v3 }
  0xb0   : > { %2260 = vmatprep.subr.mxu0 %v956_v4 }
  0xb1   : > { %2261 = vmatpush3.msra.mxu0 %v956_v4 }
  0xb2   : > { %2154 = vmatmul.mubr.f32.gmra.mxu0 %v480_v43  ;;  %2262 = vmatprep.subr.mxu0 %v955_v5 }
  0xb3   : > { %2156 = vmatprep.mubr.f32.mxu0 %v481_v44  ;;  %2263 = vmatpush3.msra.mxu0 %v955_v5 }
  0xb6   : > { %2157 = vmatmul.mubr.f32.gmra.mxu0 %v482_v45 }
  0xb7   : > { %2159 = vmatprep.mubr.f32.mxu0 %v483_v46 }
  0xba   : > { %2160 = vmatmul.mubr.f32.gmra.mxu0 %v484_v47 }
  0xbb   : > { %2162 = vmatprep.mubr.f32.mxu0 %v485_v48 }
  0xbe   : > { %2163 = vmatmul.mubr.f32.gmra.mxu0 %v486_v49 }
  0xbf   : > { %2165 = vmatprep.mubr.f32.mxu0 %v487_v50 }
  0xc2   : > { %2166 = vmatmul.mubr.f32.gmra.mxu0 %v488_v51 }
 0x156   : > { %v2134_v7 = vpop.f32.mrf.mxu0 }
 0x157   : > { %v584_v8 = vadd.f32 %v2134_v7, %v2994_v6 }
 0x158   : > { %v578_v9 = vpop.f32.mrf.mxu0 }
 0x159   : > { %v579_v10 = vadd.f32 %v2994_v6, %v578_v9  ;;  %v698_v13 = vmax.f32 %v584_v8, 0.0 }
 0x15a   : > { %v2137_v11 = vpop.f32.mrf.mxu0 }
 0x15b   : > { %v697_v12 = vmax.f32 %v579_v10, 0.0  ;;  %v594_v14 = vadd.f32 %v2137_v11, %v2994_v6 }
 0x15c   : > { %v588_v15 = vpop.f32.mrf.mxu0 }
 0x15d   : > { %v589_v16 = vadd.f32 %v2994_v6, %v588_v15  ;;  %2200 = vmatprep.mubr.f32.mxu1 %v697_v12  ;;  %v700_v20 = vmax.f32 %v594_v14, 0.0 }
 0x15e   : > { %v2140_v17 = vpop.f32.mrf.mxu0  ;;  %2201 = vmatmul.mubr.f32.vlgmr.msra.gmra.mxu1 %v698_v13 }
 0x15f   : > { %v699_v18 = vmax.f32 %v589_v16, 0.0  ;;  %v604_v19 = vadd.f32 %v2140_v17, %v2994_v6  ;;  %v954_v16 = vld [vmem:[#allocation8 + $0x8] sm:$0xff]  ;;  %v953_v17 = vld [vmem:[#allocation8] sm:$0xff] }
 0x160   : > { %v598_v21 = vpop.f32.mrf.mxu0  ;;  %2264 = vmatprep.subr.mxu0 %v954_v16 }
 0x161   : > { %v599_v22 = vadd.f32 %v2994_v6, %v598_v21  ;;  %2203 = vmatprep.mubr.f32.mxu1 %v699_v18  ;;  %v702_v23 = vmax.f32 %v604_v19, 0.0  ;;  %2265 = vmatpush3.msra.mxu0 %v954_v16  ;;  %v3023_v18 = vld [vmem:[%s3655_s4] ss:$0 sm:$0xff] }
 0x162   : > { %v2143_v24 = vpop.f32.mrf.mxu0  ;;  %2204 = vmatmul.mubr.f32.gmra.mxu1 %v700_v20  ;;  %2266 = vmatprep.subr.mxu0 %v953_v17 }
 0x163   : > { %v701_v25 = vmax.f32 %v599_v22, 0.0  ;;  %v614_v26 = vadd.f32 %v2143_v24, %v2994_v6  ;;  %2267 = vmatpush3.msra.mxu0 %v953_v17 }
 0x164   : > { %v608_v27 = vpop.f32.mrf.mxu0 }
 0x165   : > { %v609_v28 = vadd.f32 %v2994_v6, %v608_v27  ;;  %2206 = vmatprep.mubr.f32.mxu1 %v701_v25  ;;  %v704_v29 = vmax.f32 %v614_v26, 0.0 }
 0x166   : > { %v2146_v30 = vpop.f32.mrf.mxu0  ;;  %2207 = vmatmul.mubr.f32.gmra.mxu1 %v702_v23 }
 0x167   : > { %v703_v31 = vmax.f32 %v609_v28, 0.0  ;;  %v624_v32 = vadd.f32 %v2146_v30, %v2994_v6 }
 0x168   : > { %v618_v33 = vpop.f32.mrf.mxu0 }
 0x169   : > { %v619_v34 = vadd.f32 %v2994_v6, %v618_v33  ;;  %2209 = vmatprep.mubr.f32.mxu1 %v703_v31  ;;  %v706_v35 = vmax.f32 %v624_v32, 0.0 }
 0x16a   : > { %v2149_v36 = vpop.f32.mrf.mxu0  ;;  %2210 = vmatmul.mubr.f32.gmra.mxu1 %v704_v29 }
 0x16b   : > { %v705_v37 = vmax.f32 %v619_v34, 0.0  ;;  %v634_v38 = vadd.f32 %v2149_v36, %v2994_v6 }
 0x16c   : > { %v628_v39 = vpop.f32.mrf.mxu0 }
 0x16d   : > { %v629_v40 = vadd.f32 %v2994_v6, %v628_v39  ;;  %2212 = vmatprep.mubr.f32.mxu1 %v705_v37  ;;  %v708_v41 = vmax.f32 %v634_v38, 0.0 }
 0x16e   : > { %v2152_v42 = vpop.f32.mrf.mxu0  ;;  %2213 = vmatmul.mubr.f32.gmra.mxu1 %v706_v35 }
 0x16f   : > { %v707_v43 = vmax.f32 %v629_v40, 0.0  ;;  %v644_v44 = vadd.f32 %v2152_v42, %v2994_v6 }
 0x170   : > { %v638_v45 = vpop.f32.mrf.mxu0 }
 0x171   : > { %v639_v46 = vadd.f32 %v2994_v6, %v638_v45  ;;  %2215 = vmatprep.mubr.f32.mxu1 %v707_v43  ;;  %v710_v47 = vmax.f32 %v644_v44, 0.0 }
 0x172   : > { %v2155_v48 = vpop.f32.mrf.mxu0  ;;  %2216 = vmatmul.mubr.f32.gmra.mxu1 %v708_v41 }
 0x173   : > { %v709_v49 = vmax.f32 %v639_v46, 0.0  ;;  %v654_v50 = vadd.f32 %v2155_v48, %v2994_v6 }
 0x174   : > { %v648_v51 = vpop.f32.mrf.mxu0 }
 0x175   : > { %v649_v52 = vadd.f32 %v2994_v6, %v648_v51  ;;  %2218 = vmatprep.mubr.f32.mxu1 %v709_v49  ;;  %v712_v53 = vmax.f32 %v654_v50, 0.0 }
 0x176   : > { %v2158_v54 = vpop.f32.mrf.mxu0  ;;  %2219 = vmatmul.mubr.f32.gmra.mxu1 %v710_v47 }
 0x177   : > { %v711_v55 = vmax.f32 %v649_v52, 0.0  ;;  %v664_v56 = vadd.f32 %v2158_v54, %v2994_v6 }
 0x178   : > { %v658_v57 = vpop.f32.mrf.mxu0 }
 0x179   : > { %v659_v58 = vadd.f32 %v2994_v6, %v658_v57  ;;  %2221 = vmatprep.mubr.f32.mxu1 %v711_v55  ;;  %v714_v59 = vmax.f32 %v664_v56, 0.0 }
 0x17a   : > { %v2161_v60 = vpop.f32.mrf.mxu0  ;;  %2222 = vmatmul.mubr.f32.gmra.mxu1 %v712_v53 }
 0x17b   : > { %v713_v61 = vmax.f32 %v659_v58, 0.0  ;;  %v674_v62 = vadd.f32 %v2161_v60, %v2994_v6 }
 0x17c   : > { %v668_v63 = vpop.f32.mrf.mxu0 }
 0x17d   : > { %v669_v0 = vadd.f32 %v2994_v6, %v668_v63  ;;  %2224 = vmatprep.mubr.f32.mxu1 %v713_v61  ;;  %v716_v1 = vmax.f32 %v674_v62, 0.0 }
 0x17e   : > { %v2164_v2 = vpop.f32.mrf.mxu0  ;;  %2225 = vmatmul.mubr.f32.gmra.mxu1 %v714_v59 }
 0x17f   : > { %v715_v3 = vmax.f32 %v669_v0, 0.0  ;;  %v684_v4 = vadd.f32 %v2164_v2, %v2994_v6 }
 0x180   : > { %v678_v5 = vpop.f32.mrf.mxu0 }
 0x181   : > { %v679_v7 = vadd.f32 %v2994_v6, %v678_v5  ;;  %2227 = vmatprep.mubr.f32.mxu1 %v715_v3  ;;  %v718_v8 = vmax.f32 %v684_v4, 0.0 }
 0x182   : > { %v2167_v9 = vpop.f32.mrf.mxu0  ;;  %2228 = vmatmul.mubr.f32.gmra.mxu1 %v716_v1 }
 0x183   : > { %v717_v10 = vmax.f32 %v679_v7, 0.0  ;;  %v694_v11 = vadd.f32 %v2167_v9, %v2994_v6 }
 0x184   : > { %v688_v12 = vpop.f32.mrf.mxu0 }
 0x185   : > { %v689_v13 = vadd.f32 %v2994_v6, %v688_v12  ;;  %2230 = vmatprep.mubr.f32.mxu1 %v717_v10  ;;  %v720_v14 = vmax.f32 %v694_v11, 0.0 }
 0x186   : > { %2231 = vmatmul.mubr.f32.gmra.mxu1 %v718_v8 }
 0x187   : > { %v719_v15 = vmax.f32 %v689_v13, 0.0 }
 0x189   : > { %2233 = vmatprep.mubr.f32.mxu1 %v719_v15 }
 0x18a   : > { %2234 = vmatmul.mubr.f32.gmra.mxu1 %v720_v14 }
 0x21e   : > { %v2202_v19 = vpop.f32.mrf.mxu1 }
 0x21f   : > { %v816_v6 = vadd.f32 %v2202_v19, %v3023_v18 }
 0x220   : > { %v810_v20 = vpop.f32.mrf.mxu1 }
 0x221   : > { %v811_v21 = vadd.f32 %v3023_v18, %v810_v20  ;;  %v930_v24 = vmax.f32 %v816_v6, 0.0 }
 0x222   : > { %v2205_v22 = vpop.f32.mrf.mxu1 }
 0x223   : > { %v929_v23 = vmax.f32 %v811_v21, 0.0  ;;  %v826_v25 = vadd.f32 %v2205_v22, %v3023_v18 }
 0x224   : > { %v820_v26 = vpop.f32.mrf.mxu1 }
 0x225   : > { %v821_v27 = vadd.f32 %v3023_v18, %v820_v26  ;;  %2268 = vmatprep.mubr.f32.mxu0 %v929_v23  ;;  %v932_v30 = vmax.f32 %v826_v25, 0.0 }
 0x226   : > { %v2208_v28 = vpop.f32.mrf.mxu1  ;;  %2269 = vmatmul.mubr.f32.vlgmr.msra.gmra.mxu0 %v930_v24 }
 0x227   : > { %v931_v29 = vmax.f32 %v821_v27, 0.0  ;;  %v836_v31 = vadd.f32 %v2208_v28, %v3023_v18  ;;  %v3052_v28 = vld [vmem:[%s3657_s6] ss:$0 sm:$0xff] }
 0x228   : > { %v830_v32 = vpop.f32.mrf.mxu1 }
 0x229   : > { %v831_v33 = vadd.f32 %v3023_v18, %v830_v32  ;;  %2271 = vmatprep.mubr.f32.mxu0 %v931_v29  ;;  %v934_v36 = vmax.f32 %v836_v31, 0.0 }
 0x22a   : > { %v2211_v34 = vpop.f32.mrf.mxu1  ;;  %2272 = vmatmul.mubr.f32.gmra.mxu0 %v932_v30 }
 0x22b   : > { %v933_v35 = vmax.f32 %v831_v33, 0.0  ;;  %v846_v37 = vadd.f32 %v2211_v34, %v3023_v18 }
 0x22c   : > { %v840_v38 = vpop.f32.mrf.mxu1 }
 0x22d   : > { %v841_v39 = vadd.f32 %v3023_v18, %v840_v38  ;;  %2274 = vmatprep.mubr.f32.mxu0 %v933_v35  ;;  %v936_v42 = vmax.f32 %v846_v37, 0.0 }
 0x22e   : > { %v2214_v40 = vpop.f32.mrf.mxu1  ;;  %2275 = vmatmul.mubr.f32.gmra.mxu0 %v934_v36 }
 0x22f   : > { %v935_v41 = vmax.f32 %v841_v39, 0.0  ;;  %v856_v43 = vadd.f32 %v2214_v40, %v3023_v18 }
 0x230   : > { %v850_v44 = vpop.f32.mrf.mxu1 }
 0x231   : > { %v851_v45 = vadd.f32 %v3023_v18, %v850_v44  ;;  %2277 = vmatprep.mubr.f32.mxu0 %v935_v41  ;;  %v938_v48 = vmax.f32 %v856_v43, 0.0 }
 0x232   : > { %v2217_v46 = vpop.f32.mrf.mxu1  ;;  %2278 = vmatmul.mubr.f32.gmra.mxu0 %v936_v42 }
 0x233   : > { %v937_v47 = vmax.f32 %v851_v45, 0.0  ;;  %v866_v49 = vadd.f32 %v2217_v46, %v3023_v18 }
 0x234   : > { %v860_v50 = vpop.f32.mrf.mxu1 }
 0x235   : > { %v861_v51 = vadd.f32 %v3023_v18, %v860_v50  ;;  %2280 = vmatprep.mubr.f32.mxu0 %v937_v47  ;;  %v940_v54 = vmax.f32 %v866_v49, 0.0 }
 0x236   : > { %v2220_v52 = vpop.f32.mrf.mxu1  ;;  %2281 = vmatmul.mubr.f32.gmra.mxu0 %v938_v48 }
 0x237   : > { %v939_v53 = vmax.f32 %v861_v51, 0.0  ;;  %v876_v55 = vadd.f32 %v2220_v52, %v3023_v18 }
 0x238   : > { %v870_v56 = vpop.f32.mrf.mxu1 }
 0x239   : > { %v871_v57 = vadd.f32 %v3023_v18, %v870_v56  ;;  %2283 = vmatprep.mubr.f32.mxu0 %v939_v53  ;;  %v942_v60 = vmax.f32 %v876_v55, 0.0 }
 0x23a   : > { %v2223_v58 = vpop.f32.mrf.mxu1  ;;  %2284 = vmatmul.mubr.f32.gmra.mxu0 %v940_v54 }
 0x23b   : > { %v941_v59 = vmax.f32 %v871_v57, 0.0  ;;  %v886_v61 = vadd.f32 %v2223_v58, %v3023_v18 }
 0x23c   : > { %v880_v62 = vpop.f32.mrf.mxu1 }
 0x23d   : > { %v881_v63 = vadd.f32 %v3023_v18, %v880_v62  ;;  %2286 = vmatprep.mubr.f32.mxu0 %v941_v59  ;;  %v944_v2 = vmax.f32 %v886_v61, 0.0 }
 0x23e   : > { %v2226_v0 = vpop.f32.mrf.mxu1  ;;  %2287 = vmatmul.mubr.f32.gmra.mxu0 %v942_v60 }
 0x23f   : > { %v943_v1 = vmax.f32 %v881_v63, 0.0  ;;  %v896_v3 = vadd.f32 %v2226_v0, %v3023_v18 }
 0x240   : > { %v890_v4 = vpop.f32.mrf.mxu1 }
 0x241   : > { %v891_v5 = vadd.f32 %v3023_v18, %v890_v4  ;;  %2289 = vmatprep.mubr.f32.mxu0 %v943_v1  ;;  %v946_v9 = vmax.f32 %v896_v3, 0.0 }
 0x242   : > { %v2229_v7 = vpop.f32.mrf.mxu1  ;;  %2290 = vmatmul.mubr.f32.gmra.mxu0 %v944_v2 }
 0x243   : > { %v945_v8 = vmax.f32 %v891_v5, 0.0  ;;  %v906_v10 = vadd.f32 %v2229_v7, %v3023_v18 }
 0x244   : > { %v900_v11 = vpop.f32.mrf.mxu1 }
 0x245   : > { %v901_v12 = vadd.f32 %v3023_v18, %v900_v11  ;;  %2292 = vmatprep.mubr.f32.mxu0 %v945_v8  ;;  %v948_v15 = vmax.f32 %v906_v10, 0.0 }
 0x246   : > { %v2232_v13 = vpop.f32.mrf.mxu1  ;;  %2293 = vmatmul.mubr.f32.gmra.mxu0 %v946_v9 }
 0x247   : > { %v947_v14 = vmax.f32 %v901_v12, 0.0  ;;  %v916_v16 = vadd.f32 %v2232_v13, %v3023_v18 }
 0x248   : > { %v910_v17 = vpop.f32.mrf.mxu1 }
 0x249   : > { %v911_v19 = vadd.f32 %v3023_v18, %v910_v17  ;;  %2295 = vmatprep.mubr.f32.mxu0 %v947_v14  ;;  %v950_v21 = vmax.f32 %v916_v16, 0.0 }
 0x24a   : > { %v2235_v6 = vpop.f32.mrf.mxu1  ;;  %2296 = vmatmul.mubr.f32.gmra.mxu0 %v948_v15 }
 0x24b   : > { %v949_v20 = vmax.f32 %v911_v19, 0.0  ;;  %v926_v22 = vadd.f32 %v2235_v6, %v3023_v18 }
 0x24c   : > { %v920_v23 = vpop.f32.mrf.mxu1 }
 0x24d   : > { %v921_v24 = vadd.f32 %v3023_v18, %v920_v23  ;;  %2298 = vmatprep.mubr.f32.mxu0 %v949_v20  ;;  %v952_v26 = vmax.f32 %v926_v22, 0.0 }
 0x24e   : > { %2299 = vmatmul.mubr.f32.gmra.mxu0 %v950_v21 }
 0x24f   : > { %v951_v25 = vmax.f32 %v921_v24, 0.0 }
 0x251   : > { %2301 = vmatprep.mubr.f32.mxu0 %v951_v25 }
 0x252   : > { %2302 = vmatmul.mubr.f32.gmra.mxu0 %v952_v26 }
 0x2e6   : > { %v2270_v27 = vpop.f32.mrf.mxu0 }
 0x2e7   : > { %v3058_v32 = vadd.f32 %v2270_v27, %v3052_v28 }
 0x2e8   : > { %v1042_v29 = vpop.f32.mrf.mxu0 }
 0x2e9   : > { %v3055_v30 = vadd.f32 %v3052_v28, %v1042_v29  ;;  %v1162_v36 = vmax.f32 %v3058_v32, 0.0 }
 0x2ea   : > { %v2273_v31 = vpop.f32.mrf.mxu0 }
 0x2eb   : > { %v1161_v18 = vmax.f32 %v3055_v30, 0.0  ;;  %v3068_v37 = vadd.f32 %v2273_v31, %v3052_v28 }
 0x2ec   : > { %v1052_v33 = vpop.f32.mrf.mxu0 }
 0x2ed   : > { %v3062_v34 = vadd.f32 %v3052_v28, %v1052_v33  ;;  %1185 = vadd.xlane.f32.xlu0 %v1161_v18  ;;  %v1164_v42 = vmax.f32 %v3068_v37, 0.0 }
 0x2ee   : > { %v2276_v35 = vpop.f32.mrf.mxu0 }
 0x2ef   : > { %v1163_v38 = vmax.f32 %v3062_v34, 0.0  ;;  %v3080_v43 = vadd.f32 %v2276_v35, %v3052_v28 }
 0x2f0   : > { %v1062_v39 = vpop.f32.mrf.mxu0 }
 0x2f1   : > { %v3072_v40 = vadd.f32 %v3052_v28, %v1062_v39  ;;  %1189 = vadd.xlane.f32.xlu1 %v1163_v38  ;;  %1187 = vadd.xlane.f32.xlu0 %v1162_v36  ;;  %v1166_v48 = vmax.f32 %v3080_v43, 0.0 }
 0x2f2   : > { %v2279_v41 = vpop.f32.mrf.mxu0 }
 0x2f3   : > { %v1165_v44 = vmax.f32 %v3072_v40, 0.0  ;;  %v3092_v49 = vadd.f32 %v2279_v41, %v3052_v28 }
 0x2f4   : > { %v1072_v45 = vpop.f32.mrf.mxu0 }
 0x2f5   : > { %v3084_v46 = vadd.f32 %v3052_v28, %v1072_v45  ;;  %1191 = vadd.xlane.f32.xlu1 %v1164_v42  ;;  %1193 = vadd.xlane.f32.xlu0 %v1165_v44  ;;  %v1168_v54 = vmax.f32 %v3092_v49, 0.0 }
 0x2f6   : > { %v2282_v47 = vpop.f32.mrf.mxu0 }
 0x2f7   : > { %v1167_v50 = vmax.f32 %v3084_v46, 0.0  ;;  %v3104_v55 = vadd.f32 %v2282_v47, %v3052_v28 }
 0x2f8   : > { %v1082_v51 = vpop.f32.mrf.mxu0 }
 0x2f9   : > { %v3096_v52 = vadd.f32 %v3052_v28, %v1082_v51  ;;  %1195 = vadd.xlane.f32.xlu1 %v1166_v48  ;;  %1197 = vadd.xlane.f32.xlu0 %v1167_v50  ;;  %v1170_v60 = vmax.f32 %v3104_v55, 0.0  ;;  %v1574_v51 = vld [vmem:[#allocation10 + $0x78] sm:$0xff] }
 0x2fa   : > { %v2285_v53 = vpop.f32.mrf.mxu0  ;;  %2304 = vmatprep.subr.mxu1 %v1574_v51 }
 0x2fb   : > { %v1169_v56 = vmax.f32 %v3096_v52, 0.0  ;;  %v3116_v61 = vadd.f32 %v2285_v53, %v3052_v28  ;;  %v1573_v53 = vld [vmem:[#allocation10 + $0x70] sm:$0xff]  ;;  %2305 = vmatpush3.msra.mxu1 %v1574_v51 }
 0x2fc   : > { %v1092_v57 = vpop.f32.mrf.mxu0  ;;  %2306 = vmatprep.subr.mxu1 %v1573_v53 }
 0x2fd   : > { %v3108_v58 = vadd.f32 %v3052_v28, %v1092_v57  ;;  %1199 = vadd.xlane.f32.xlu1 %v1168_v54  ;;  %1201 = vadd.xlane.f32.xlu0 %v1169_v56  ;;  %v1172_v2 = vmax.f32 %v3116_v61, 0.0  ;;  %v1572_v57 = vld [vmem:[#allocation10 + $0x68] sm:$0xff] }
 0x2fe   : > { %v2288_v59 = vpop.f32.mrf.mxu0  ;;  %2307 = vmatpush3.msra.mxu1 %v1573_v53 }
 0x2ff   : > { %v1171_v62 = vmax.f32 %v3108_v58, 0.0  ;;  %v3128_v3 = vadd.f32 %v2288_v59, %v3052_v28  ;;  %2308 = vmatprep.subr.mxu1 %v1572_v57  ;;  %v1570_v59 = vld [vmem:[#allocation10 + $0x58] sm:$0xff] }
 0x300   : > { %v1102_v63 = vpop.f32.mrf.mxu0  ;;  %2309 = vmatpush3.msra.mxu1 %v1572_v57 }
 0x301   : > { %v3120_v0 = vadd.f32 %v3052_v28, %v1102_v63  ;;  %1203 = vadd.xlane.f32.xlu1 %v1170_v60  ;;  %1205 = vadd.xlane.f32.xlu0 %v1171_v62  ;;  %v1174_v9 = vmax.f32 %v3128_v3, 0.0  ;;  %v1569_v63 = vld [vmem:[#allocation10 + $0x50] sm:$0xff] }
 0x302   : > { %v2291_v1 = vpop.f32.mrf.mxu0 }
 0x303   : > { %v1173_v4 = vmax.f32 %v3120_v0, 0.0  ;;  %v3140_v10 = vadd.f32 %v2291_v1, %v3052_v28  ;;  %v1568_v1 = vld [vmem:[#allocation10 + $0x48] sm:$0xff] }
 0x304   : > { %v1112_v5 = vpop.f32.mrf.mxu0 }
 0x305   : > { %v3132_v7 = vadd.f32 %v3052_v28, %v1112_v5  ;;  %1207 = vadd.xlane.f32.xlu1 %v1172_v2  ;;  %1209 = vadd.xlane.f32.xlu0 %v1173_v4  ;;  %v1176_v15 = vmax.f32 %v3140_v10, 0.0 }
 0x306   : > { %v2294_v8 = vpop.f32.mrf.mxu0 }
 0x307   : > { %v1175_v11 = vmax.f32 %v3132_v7, 0.0  ;;  %v3152_v16 = vadd.f32 %v2294_v8, %v3052_v28 }
 0x308   : > { %v1122_v12 = vpop.f32.mrf.mxu0 }
 0x309   : > { %v3144_v13 = vadd.f32 %v3052_v28, %v1122_v12  ;;  %1211 = vadd.xlane.f32.xlu1 %v1174_v9  ;;  %1213 = vadd.xlane.f32.xlu0 %v1175_v11  ;;  %v1178_v21 = vmax.f32 %v3152_v16, 0.0 }
 0x30a   : > { %v2297_v14 = vpop.f32.mrf.mxu0 }
 0x30b   : > { %v1177_v17 = vmax.f32 %v3144_v13, 0.0  ;;  %v3164_v22 = vadd.f32 %v2297_v14, %v3052_v28 }
 0x30c   : > { %v1132_v19 = vpop.f32.mrf.mxu0 }
 0x30d   : > { %v3156_v6 = vadd.f32 %v3052_v28, %v1132_v19  ;;  %1215 = vadd.xlane.f32.xlu1 %v1176_v15  ;;  %1217 = vadd.xlane.f32.xlu0 %v1177_v17  ;;  %v1180_v27 = vmax.f32 %v3164_v22, 0.0 }
 0x30e   : > { %v2300_v20 = vpop.f32.mrf.mxu0 }
 0x30f   : > { %v1179_v23 = vmax.f32 %v3156_v6, 0.0  ;;  %v3176_v29 = vadd.f32 %v2300_v20, %v3052_v28  ;;  %v1561_v6 = vld [vmem:[#allocation10 + $0x10] sm:$0xff] }
 0x310   : > { %v1142_v24 = vpop.f32.mrf.mxu0 }
 0x311   : > { %v3168_v25 = vadd.f32 %v3052_v28, %v1142_v24  ;;  %1219 = vadd.xlane.f32.xlu1 %v1178_v21  ;;  %1221 = vadd.xlane.f32.xlu0 %v1179_v23  ;;  %v1182_v39 = vmax.f32 %v3176_v29, 0.0 }
 0x312   : > { %v2303_v26 = vpop.f32.mrf.mxu0 }
 0x313   : > { %v1181_v31 = vmax.f32 %v3168_v25, 0.0  ;;  %v3188_v41 = vadd.f32 %v2303_v26, %v3052_v28  ;;  %v1559_v25 = vld [vmem:[#allocation10] sm:$0xff] }
 0x314   : > { %v1152_v33 = vpop.f32.mrf.mxu0 }
 0x315   : > { %v3180_v35 = vadd.f32 %v3052_v28, %v1152_v33  ;;  %1223 = vadd.xlane.f32.xlu1 %v1180_v27  ;;  %1225 = vadd.xlane.f32.xlu0 %v1181_v31  ;;  %v1184_v47 = vmax.f32 %v3188_v41, 0.0  ;;  %v1571_v28 = vld [vmem:[#allocation10 + $0x60] sm:$0xff] }
 0x316   : > { %2310 = vmatprep.subr.mxu1 %v1571_v28 }
 0x317   : > { %v1183_v45 = vmax.f32 %v3180_v35, 0.0  ;;  %2311 = vmatpush3.msra.mxu1 %v1571_v28 }
 0x318   : > { %2312 = vmatprep.subr.mxu1 %v1570_v59 }
 0x319   : > { %1227 = vadd.xlane.f32.xlu1 %v1182_v39  ;;  %1229 = vadd.xlane.f32.xlu0 %v1183_v45 }
 0x31a   : > { %2313 = vmatpush3.msra.mxu1 %v1570_v59 }
 0x31b   : > { %2314 = vmatprep.subr.mxu1 %v1569_v63 }
 0x31c   : > { %2315 = vmatpush3.msra.mxu1 %v1569_v63 }
 0x31d   : > { %1231 = vadd.xlane.f32.xlu1 %v1184_v47  ;;  %2316 = vmatprep.subr.mxu1 %v1568_v1 }
 0x31e   : > { %2317 = vmatpush3.msra.mxu1 %v1568_v1 }
 0x376   : > { %v1186_v5 = vpop.xlane.xlu0 %1185 }
 0x377   : > { %v3198_v8 = vmul.f32 0.015625, %v1186_v5 }
 0x379   : > { %v3203_v12 = vsub.f32 %v1161_v18, %v3198_v8 }
 0x37a   : > { %v1190_v14 = vpop.xlane.xlu1 %1189  ;;  %v1188_v19 = vpop.xlane.xlu0 %1187 }
 0x37b   : > { %v3205_v20 = vmul.f32 0.015625, %v1190_v14  ;;  %v3207_v24 = vmul.f32 0.015625, %v1188_v19  ;;  %v1281_v26 = vmul.f32 %v3203_v12, %v3203_v12 }
 0x37d   : > { %v3214_v33 = vsub.f32 %v1163_v38, %v3205_v20  ;;  %v3219_v30 = vsub.f32 %v1162_v36, %v3207_v24  ;;  %1305 = vadd.xlane.f32.xlu0 %v1281_v26 }
 0x37e   : > { %v1192_v18 = vpop.xlane.xlu1 %1191  ;;  %v1194_v51 = vpop.xlane.xlu0 %1193 }
 0x37f   : > { %v3221_v53 = vmul.f32 0.015625, %v1192_v18  ;;  %v3223_v57 = vmul.f32 0.015625, %v1194_v51  ;;  %v1283_v28 = vmul.f32 %v3214_v33, %v3214_v33  ;;  %v1282_v34 = vmul.f32 %v3219_v30, %v3219_v30 }
 0x381   : > { %v3232_v38 = vsub.f32 %v1164_v42, %v3221_v53  ;;  %v3237_v32 = vsub.f32 %v1165_v44, %v3223_v57  ;;  %1309 = vadd.xlane.f32.xlu0 %v1283_v28  ;;  %1307 = vadd.xlane.f32.xlu1 %v1282_v34 }
 0x382   : > { %v1196_v36 = vpop.xlane.xlu1 %1195  ;;  %v1198_v59 = vpop.xlane.xlu0 %1197 }
 0x383   : > { %v3239_v63 = vmul.f32 0.015625, %v1196_v36  ;;  %v3241_v1 = vmul.f32 0.015625, %v1198_v59  ;;  %v1284_v5 = vmul.f32 %v3232_v38, %v3232_v38  ;;  %v1285_v37 = vmul.f32 %v3237_v32, %v3237_v32 }
 0x385   : > { %v3250_v40 = vsub.f32 %v1166_v48, %v3239_v63  ;;  %v3255_v42 = vsub.f32 %v1167_v50, %v3241_v1  ;;  %1313 = vadd.xlane.f32.xlu0 %v1285_v37  ;;  %1311 = vadd.xlane.f32.xlu1 %v1284_v5 }
 0x386   : > { %v1200_v44 = vpop.xlane.xlu1 %1199  ;;  %v1202_v14 = vpop.xlane.xlu0 %1201 }
 0x387   : > { %v3257_v19 = vmul.f32 0.015625, %v1200_v44  ;;  %v3259_v26 = vmul.f32 0.015625, %v1202_v14  ;;  %v1286_v18 = vmul.f32 %v3250_v40, %v3250_v40  ;;  %v1287_v43 = vmul.f32 %v3255_v42, %v3255_v42 }
 0x389   : > { %v3268_v46 = vsub.f32 %v1168_v54, %v3257_v19  ;;  %v3273_v48 = vsub.f32 %v1169_v56, %v3259_v26  ;;  %1317 = vadd.xlane.f32.xlu0 %v1287_v43  ;;  %1315 = vadd.xlane.f32.xlu1 %v1286_v18  ;;  %v1567_v56 = vld [vmem:[#allocation10 + $0x40] sm:$0xff]  ;;  %v1566_v43 = vld [vmem:[#allocation10 + $0x38] sm:$0xff] }
 0x38a   : > { %v1204_v50 = vpop.xlane.xlu1 %1203  ;;  %v1206_v51 = vpop.xlane.xlu0 %1205  ;;  %2318 = vmatprep.subr.mxu1 %v1567_v56 }
 0x38b   : > { %v3275_v28 = vmul.f32 0.015625, %v1204_v50  ;;  %v3277_v34 = vmul.f32 0.015625, %v1206_v51  ;;  %v1288_v36 = vmul.f32 %v3268_v46, %v3268_v46  ;;  %v1289_v49 = vmul.f32 %v3273_v48, %v3273_v48  ;;  %2319 = vmatpush3.msra.mxu1 %v1567_v56  ;;  %v1565_v56 = vld [vmem:[#allocation10 + $0x30] sm:$0xff] }
 0x38c   : > { %2320 = vmatprep.subr.mxu1 %v1566_v43 }
 0x38d   : > { %v3286_v52 = vsub.f32 %v1170_v60, %v3275_v28  ;;  %v3291_v54 = vsub.f32 %v1171_v62, %v3277_v34  ;;  %1321 = vadd.xlane.f32.xlu0 %v1289_v49  ;;  %1319 = vadd.xlane.f32.xlu1 %v1288_v36 }
 0x38e   : > { %v1208_v59 = vpop.xlane.xlu1 %1207  ;;  %v1210_v5 = vpop.xlane.xlu0 %1209  ;;  %2321 = vmatpush3.msra.mxu1 %v1566_v43 }
 0x38f   : > { %v3293_v37 = vmul.f32 0.015625, %v1208_v59  ;;  %v3295_v44 = vmul.f32 0.015625, %v1210_v5  ;;  %v1290_v55 = vmul.f32 %v3286_v52, %v3286_v52  ;;  %v1291_v60 = vmul.f32 %v3291_v54, %v3291_v54  ;;  %2322 = vmatprep.subr.mxu1 %v1565_v56 }
 0x390   : > { %2323 = vmatpush3.msra.mxu1 %v1565_v56 }
 0x391   : > { %v3304_v58 = vsub.f32 %v1172_v2, %v3293_v37  ;;  %v3309_v62 = vsub.f32 %v1173_v4, %v3295_v44  ;;  %1325 = vadd.xlane.f32.xlu0 %v1291_v60  ;;  %1323 = vadd.xlane.f32.xlu1 %v1290_v55 }
 0x392   : > { %v1212_v14 = vpop.xlane.xlu1 %1211  ;;  %v1214_v18 = vpop.xlane.xlu0 %1213 }
 0x393   : > { %v3311_v50 = vmul.f32 0.015625, %v1212_v14  ;;  %v3313_v51 = vmul.f32 0.015625, %v1214_v18  ;;  %v1292_v36 = vmul.f32 %v3304_v58, %v3304_v58  ;;  %v1293_v61 = vmul.f32 %v3309_v62, %v3309_v62  ;;  %v1563_v18 = vld [vmem:[#allocation10 + $0x20] sm:$0xff] }
 0x395   : > { %v3322_v0 = vsub.f32 %v1174_v9, %v3311_v50  ;;  %v3327_v2 = vsub.f32 %v1175_v11, %v3313_v51  ;;  %1329 = vadd.xlane.f32.xlu0 %v1293_v61  ;;  %1327 = vadd.xlane.f32.xlu1 %v1292_v36  ;;  %v1564_v9 = vld [vmem:[#allocation10 + $0x28] sm:$0xff]  ;;  %v1562_v61 = vld [vmem:[#allocation10 + $0x18] sm:$0xff] }
 0x396   : > { %v1216_v4 = vpop.xlane.xlu1 %1215  ;;  %v1218_v49 = vpop.xlane.xlu0 %1217  ;;  %2324 = vmatprep.subr.mxu1 %v1564_v9 }
 0x397   : > { %v3329_v59 = vmul.f32 0.015625, %v1216_v4  ;;  %v3331_v5 = vmul.f32 0.015625, %v1218_v49  ;;  %v1294_v55 = vmul.f32 %v3322_v0, %v3322_v0  ;;  %v1295_v3 = vmul.f32 %v3327_v2, %v3327_v2  ;;  %2325 = vmatpush3.msra.mxu1 %v1564_v9  ;;  %v1560_v9 = vld [vmem:[#allocation10 + $0x8] sm:$0xff] }
 0x398   : > { %2326 = vmatprep.subr.mxu1 %v1563_v18 }
 0x399   : > { %v3340_v7 = vsub.f32 %v1176_v15, %v3329_v59  ;;  %v3345_v11 = vsub.f32 %v1177_v17, %v3331_v5  ;;  %1333 = vadd.xlane.f32.xlu0 %v1295_v3  ;;  %1331 = vadd.xlane.f32.xlu1 %v1294_v55 }
 0x39a   : > { %v1220_v60 = vpop.xlane.xlu1 %1219  ;;  %v1222_v14 = vpop.xlane.xlu0 %1221  ;;  %2327 = vmatpush3.msra.mxu1 %v1563_v18 }
 0x39b   : > { %v3347_v43 = vmul.f32 0.015625, %v1220_v60  ;;  %v3349_v36 = vmul.f32 0.015625, %v1222_v14  ;;  %v1296_v10 = vmul.f32 %v3340_v7, %v3340_v7  ;;  %v1297_v15 = vmul.f32 %v3345_v11, %v3345_v11  ;;  %2328 = vmatprep.subr.mxu1 %v1562_v61 }
 0x39c   : > { %2329 = vmatpush3.msra.mxu1 %v1562_v61 }
 0x39d   : > { %v3358_v13 = vsub.f32 %v1178_v21, %v3347_v43  ;;  %v3363_v17 = vsub.f32 %v1179_v23, %v3349_v36  ;;  %1337 = vadd.xlane.f32.xlu0 %v1297_v15  ;;  %1335 = vadd.xlane.f32.xlu1 %v1296_v10 }
 0x39e   : > { %v1224_v4 = vpop.xlane.xlu1 %1223  ;;  %v1226_v49 = vpop.xlane.xlu0 %1225  ;;  %2330 = vmatprep.subr.mxu1 %v1561_v6 }
 0x39f   : > { %v3365_v56 = vmul.f32 0.015625, %v1224_v4  ;;  %v3367_v55 = vmul.f32 0.015625, %v1226_v49  ;;  %v1298_v16 = vmul.f32 %v3358_v13, %v3358_v13  ;;  %v1299_v21 = vmul.f32 %v3363_v17, %v3363_v17  ;;  %2331 = vmatpush3.msra.mxu1 %v1561_v6 }
 0x3a0   : > { %2332 = vmatprep.subr.mxu1 %v1560_v9 }
 0x3a1   : > { %v3376_v23 = vsub.f32 %v1180_v27, %v3365_v56  ;;  %v3381_v3 = vsub.f32 %v1181_v31, %v3367_v55  ;;  %1341 = vadd.xlane.f32.xlu0 %v1299_v21  ;;  %1339 = vadd.xlane.f32.xlu1 %v1298_v16 }
 0x3a2   : > { %v1228_v60 = vpop.xlane.xlu1 %1227  ;;  %v1230_v14 = vpop.xlane.xlu0 %1229  ;;  %2333 = vmatpush3.msra.mxu1 %v1560_v9 }
 0x3a3   : > { %v3383_v18 = vmul.f32 0.015625, %v1228_v60  ;;  %v3385_v10 = vmul.f32 0.015625, %v1230_v14  ;;  %v1300_v22 = vmul.f32 %v3376_v23, %v3376_v23  ;;  %v1301_v27 = vmul.f32 %v3381_v3, %v3381_v3  ;;  %2334 = vmatprep.subr.mxu1 %v1559_v25 }
 0x3a4   : > { %2335 = vmatpush3.msra.mxu1 %v1559_v25  ;;  %v1379_v60 = vmul.f32 %v3205_v20, %v3205_v20  ;;  %v1380_v20 = vmul.f32 %v3221_v53, %v3221_v53 }
 0x3a5   : > { %v3394_v31 = vsub.f32 %v1182_v39, %v3383_v18  ;;  %v3399_v15 = vsub.f32 %v1183_v45, %v3385_v10  ;;  %1345 = vadd.xlane.f32.xlu0 %v1301_v27  ;;  %1343 = vadd.xlane.f32.xlu1 %v1300_v22  ;;  %v1377_v45 = vmul.f32 %v3198_v8, %v3198_v8 }
 0x3a6   : > { %v1232_v61 = vpop.xlane.xlu1 %1231  ;;  %v1378_v22 = vmul.f32 %v3207_v24, %v3207_v24  ;;  %v1381_v8 = vmul.f32 %v3223_v57, %v3223_v57  ;;  %v1382_v57 = vmul.f32 %v3239_v63, %v3239_v63 }
 0x3a7   : > { %v3401_v4 = vmul.f32 0.015625, %v1232_v61  ;;  %v1302_v49 = vmul.f32 %v3394_v31, %v3394_v31  ;;  %v1303_v16 = vmul.f32 %v3399_v15, %v3399_v15 }
 0x3a9   : > { %v3410_v29 = vsub.f32 %v1184_v47, %v3401_v4  ;;  %1349 = vadd.xlane.f32.xlu0 %v1303_v16  ;;  %1347 = vadd.xlane.f32.xlu1 %v1302_v49 }
 0x3ab   : > { %v1304_v35 = vmul.f32 %v3410_v29, %v3410_v29 }
 0x3ad   : > { %1351 = vadd.xlane.f32.xlu1 %v1304_v35 }
 0x406   : > { %v1306_v39 = vpop.xlane.xlu0 %1305 }
 0x407   : > { %v1353_v21 = vmul.f32 0.015625, %v1306_v39 }
 0x409   : > { %v1401_v6 = vsub.f32 %v1353_v21, %v1377_v45 }
 0x40a   : > { %v1310_v9 = vpop.xlane.xlu0 %1309  ;;  %v1308_v41 = vpop.xlane.xlu1 %1307 }
 0x40b   : > { %v1425_v14 = vadd.f32 1e-05, %v1401_v6  ;;  %v1355_v47 = vmul.f32 0.015625, %v1310_v9  ;;  %v1354_v27 = vmul.f32 0.015625, %v1308_v41 }
 0x40d   : > { %2465 = vrsqrt.f32 %v1425_v14  ;;  %v1403_v25 = vsub.f32 %v1355_v47, %v1379_v60  ;;  %v1402_v61 = vsub.f32 %v1354_v27, %v1378_v22  ;;  %v1383_v60 = vmul.f32 %v3241_v1, %v3241_v1 }
 0x40e   : > { %v1314_v49 = vpop.xlane.xlu0 %1313  ;;  %v1312_v35 = vpop.xlane.xlu1 %1311  ;;  %v1384_v1 = vmul.f32 %v3257_v19, %v3257_v19 }
 0x40f   : > { %v1427_v16 = vadd.f32 1e-05, %v1403_v25  ;;  %v1357_v39 = vmul.f32 0.015625, %v1314_v49  ;;  %v1426_v45 = vadd.f32 1e-05, %v1402_v61  ;;  %v1356_v21 = vmul.f32 0.015625, %v1312_v35 }
 0x410   : > { %v1385_v49 = vmul.f32 %v3259_v26, %v3259_v26  ;;  %v1387_v26 = vmul.f32 %v3277_v34, %v3277_v34 }
 0x411   : > { %2467 = vrsqrt.f32 %v1427_v16  ;;  %v1405_v6 = vsub.f32 %v1357_v39, %v1381_v8  ;;  %v1404_v24 = vsub.f32 %v1356_v21, %v1380_v20 }
 0x412   : > { %2469 = vrsqrt.f32 %v1426_v45  ;;  %v1318_v9 = vpop.xlane.xlu0 %1317  ;;  %v1316_v41 = vpop.xlane.xlu1 %1315 }
 0x413   : > { %v1429_v14 = vadd.f32 1e-05, %v1405_v6  ;;  %v1359_v47 = vmul.f32 0.015625, %v1318_v9  ;;  %v1428_v22 = vadd.f32 1e-05, %v1404_v24  ;;  %v1358_v27 = vmul.f32 0.015625, %v1316_v41 }
 0x414   : > { %v3435_v24 = vld [vmem:[%s3658_s7] ss:$0 sm:$0xff]  ;;  %v1386_v41 = vmul.f32 %v3275_v28, %v3275_v28 }
 0x415   : > { %2471 = vrsqrt.f32 %v1429_v14  ;;  %v1407_v53 = vsub.f32 %v1359_v47, %v1383_v60  ;;  %v1406_v25 = vsub.f32 %v1358_v27, %v1382_v57 }
 0x416   : > { %2473 = vrsqrt.f32 %v1428_v22  ;;  %v1322_v61 = vpop.xlane.xlu0 %1321  ;;  %v1320_v16 = vpop.xlane.xlu1 %1319  ;;  %v3445_v22 = vld [vmem:[%s3659_s8] ss:$0 sm:$0xff] }
 0x417   : > { %v1431_v8 = vadd.f32 1e-05, %v1407_v53  ;;  %v1361_v35 = vmul.f32 0.015625, %v1322_v61  ;;  %v1430_v39 = vadd.f32 1e-05, %v1406_v25  ;;  %v1360_v20 = vmul.f32 0.015625, %v1320_v16 }
 0x418   : > { %v1389_v25 = vmul.f32 %v3295_v44, %v3295_v44  ;;  %v1390_v44 = vmul.f32 %v3311_v50, %v3311_v50 }
 0x419   : > { %2475 = vrsqrt.f32 %v1431_v8  ;;  %v1409_v63 = vsub.f32 %v1361_v35, %v1385_v49  ;;  %v1408_v21 = vsub.f32 %v1360_v20, %v1384_v1 }
 0x41a   : > { %v2466_v45 = vpop.eup %2465  ;;  %2477 = vrsqrt.f32 %v1430_v39  ;;  %v1326_v6 = vpop.xlane.xlu0 %1325  ;;  %v1388_v39 = vmul.f32 %v3293_v37, %v3293_v37 }
 0x41b   : > { %v1433_v9 = vadd.f32 1e-05, %v1409_v63  ;;  %v1324_v60 = vpop.xlane.xlu1 %1323  ;;  %v1363_v14 = vmul.f32 0.015625, %v1326_v6  ;;  %v1473_v19 = vmul.f32 %v2466_v45, %v3203_v12  ;;  %v1432_v47 = vadd.f32 1e-05, %v1408_v21 }
 0x41c   : > { %v1362_v57 = vmul.f32 0.015625, %v1324_v60 }
 0x41d   : > { %2479 = vrsqrt.f32 %v1433_v9  ;;  %v1411_v27 = vsub.f32 %v1363_v14, %v1387_v26  ;;  %v1504_v53 = vmul.f32 %v3435_v24, %v1473_v19  ;;  %v1391_v9 = vmul.f32 %v3313_v51, %v3313_v51 }
 0x41e   : > { %v2468_v34 = vpop.eup %2467  ;;  %2481 = vrsqrt.f32 %v1432_v47  ;;  %v1410_v12 = vsub.f32 %v1362_v57, %v1386_v41  ;;  %v1330_v61 = vpop.xlane.xlu0 %1329  ;;  %v1392_v51 = vmul.f32 %v3329_v59, %v3329_v59 }
 0x41f   : > { %v2470_v49 = vpop.eup %2469  ;;  %v1435_v28 = vadd.f32 1e-05, %v1411_v27  ;;  %v1328_v8 = vpop.xlane.xlu1 %1327  ;;  %v1365_v16 = vmul.f32 0.015625, %v1330_v61  ;;  %v1535_v35 = vadd.f32 %v3445_v22, %v1504_v53  ;;  %v1475_v1 = vmul.f32 %v2468_v34, %v3214_v33 }
 0x420   : > { %v1434_v20 = vadd.f32 1e-05, %v1410_v12  ;;  %v1364_v63 = vmul.f32 0.015625, %v1328_v8  ;;  %v1474_v45 = vmul.f32 %v2470_v49, %v3219_v30  ;;  %v1393_v49 = vmul.f32 %v3331_v5, %v3331_v5 }
 0x421   : > { %2483 = vrsqrt.f32 %v1435_v28  ;;  %v1413_v21 = vsub.f32 %v1365_v16, %v1389_v25  ;;  %2336 = vmatprep.mubr.f32.mxu1 %v1535_v35  ;;  %v1506_v6 = vmul.f32 %v3435_v24, %v1475_v1 }
 0x422   : > { %v2472_v26 = vpop.eup %2471  ;;  %2485 = vrsqrt.f32 %v1434_v20  ;;  %v1412_v33 = vsub.f32 %v1364_v63, %v1388_v39  ;;  %v1334_v60 = vpop.xlane.xlu0 %1333  ;;  %v1505_v37 = vmul.f32 %v3435_v24, %v1474_v45 }
 0x423   : > { %v2474_v14 = vpop.eup %2473  ;;  %v1437_v19 = vadd.f32 1e-05, %v1413_v21  ;;  %v1332_v30 = vpop.xlane.xlu1 %1331  ;;  %v1367_v41 = vmul.f32 0.015625, %v1334_v60  ;;  %v1537_v50 = vadd.f32 %v3445_v22, %v1506_v6  ;;  %v1477_v47 = vmul.f32 %v2472_v26, %v3237_v32 }
 0x424   : > { %v1436_v57 = vadd.f32 1e-05, %v1412_v33  ;;  %v1366_v27 = vmul.f32 0.015625, %v1332_v30  ;;  %v1536_v53 = vadd.f32 %v3445_v22, %v1505_v37  ;;  %v1476_v34 = vmul.f32 %v2474_v14, %v3232_v38 }
 0x425   : > { %2487 = vrsqrt.f32 %v1437_v19  ;;  %v1415_v25 = vsub.f32 %v1367_v41, %v1391_v9  ;;  %v1508_v12 = vmul.f32 %v3435_v24, %v1477_v47  ;;  %v1395_v9 = vmul.f32 %v3349_v36, %v3349_v36 }
 0x426   : > { %v2476_v61 = vpop.eup %2475  ;;  %2489 = vrsqrt.f32 %v1436_v57  ;;  %v1414_v28 = vsub.f32 %v1366_v27, %v1390_v44  ;;  %2337 = vmatmul.mubr.f32.vlgmr.msra.gmra.mxu1 %v1536_v53  ;;  %v1338_v32 = vpop.xlane.xlu0 %1337  ;;  %v1507_v8 = vmul.f32 %v3435_v24, %v1476_v34  ;;  %v1394_v44 = vmul.f32 %v3347_v43, %v3347_v43 }
 0x427   : > { %v2478_v16 = vpop.eup %2477  ;;  %v1439_v35 = vadd.f32 1e-05, %v1415_v25  ;;  %v1336_v38 = vpop.xlane.xlu1 %1335  ;;  %2339 = vmatprep.mubr.f32.mxu1 %v1537_v50  ;;  %v1369_v1 = vmul.f32 0.015625, %v1338_v32  ;;  %v1539_v59 = vadd.f32 %v3445_v22, %v1508_v12  ;;  %v1479_v39 = vmul.f32 %v2476_v61, %v3255_v42 }
 0x428   : > { %v1438_v20 = vadd.f32 1e-05, %v1414_v28  ;;  %v1368_v63 = vmul.f32 0.015625, %v1336_v38  ;;  %v1538_v45 = vadd.f32 %v3445_v22, %v1507_v8  ;;  %v1478_v5 = vmul.f32 %v2478_v16, %v3250_v40 }
 0x429   : > { %2491 = vrsqrt.f32 %v1439_v35  ;;  %v1417_v21 = vsub.f32 %v1369_v1, %v1393_v49  ;;  %v1510_v6 = vmul.f32 %v3435_v24, %v1479_v39  ;;  %v1396_v57 = vmul.f32 %v3365_v56, %v3365_v56 }
 0x42a   : > { %v2480_v26 = vpop.eup %2479  ;;  %2493 = vrsqrt.f32 %v1438_v20  ;;  %v1416_v33 = vsub.f32 %v1368_v63, %v1392_v51  ;;  %2340 = vmatmul.mubr.f32.gmra.mxu1 %v1538_v45  ;;  %v1342_v42 = vpop.xlane.xlu0 %1341  ;;  %v1509_v60 = vmul.f32 %v3435_v24, %v1478_v5  ;;  %v1397_v51 = vmul.f32 %v3367_v55, %v3367_v55 }
 0x42b   : > { %v2482_v37 = vpop.eup %2481  ;;  %v1441_v14 = vadd.f32 1e-05, %v1417_v21  ;;  %v1340_v40 = vpop.xlane.xlu1 %1339  ;;  %2342 = vmatprep.mubr.f32.mxu1 %v1539_v59  ;;  %v1371_v19 = vmul.f32 0.015625, %v1342_v42  ;;  %v1541_v43 = vadd.f32 %v3445_v22, %v1510_v6  ;;  %v1481_v30 = vmul.f32 %v2480_v26, %v3273_v48 }
 0x42c   : > { %v1440_v41 = vadd.f32 1e-05, %v1416_v33  ;;  %v1370_v50 = vmul.f32 0.015625, %v1340_v40  ;;  %v1540_v47 = vadd.f32 %v3445_v22, %v1509_v60  ;;  %v1480_v36 = vmul.f32 %v2482_v37, %v3268_v46 }
 0x42d   : > { %2495 = vrsqrt.f32 %v1441_v14  ;;  %v1419_v27 = vsub.f32 %v1371_v19, %v1395_v9  ;;  %v1512_v53 = vmul.f32 %v3435_v24, %v1481_v30  ;;  %v1398_v38 = vmul.f32 %v3383_v18, %v3383_v18 }
 0x42e   : > { %v2484_v34 = vpop.eup %2483  ;;  %2497 = vrsqrt.f32 %v1440_v41  ;;  %v1418_v25 = vsub.f32 %v1370_v50, %v1394_v44  ;;  %2343 = vmatmul.mubr.f32.gmra.mxu1 %v1540_v47  ;;  %v1346_v48 = vpop.xlane.xlu0 %1345  ;;  %v1511_v12 = vmul.f32 %v3435_v24, %v1480_v36  ;;  %v1399_v20 = vmul.f32 %v3385_v10, %v3385_v10 }
 0x42f   : > { %v2486_v61 = vpop.eup %2485  ;;  %v1443_v49 = vadd.f32 1e-05, %v1419_v27  ;;  %v1344_v46 = vpop.xlane.xlu1 %1343  ;;  %2345 = vmatprep.mubr.f32.mxu1 %v1541_v43  ;;  %v1373_v28 = vmul.f32 0.015625, %v1346_v48  ;;  %v1543_v56 = vadd.f32 %v3445_v22, %v1512_v53  ;;  %v1483_v32 = vmul.f32 %v2484_v34, %v3291_v54 }
 0x430   : > { %v1442_v8 = vadd.f32 1e-05, %v1418_v25  ;;  %v1372_v16 = vmul.f32 0.015625, %v1344_v46  ;;  %v1542_v35 = vadd.f32 %v3445_v22, %v1511_v12  ;;  %v1482_v55 = vmul.f32 %v2486_v61, %v3286_v52 }
 0x431   : > { %2499 = vrsqrt.f32 %v1443_v49  ;;  %v1421_v1 = vsub.f32 %v1373_v28, %v1397_v51  ;;  %v1514_v59 = vmul.f32 %v3435_v24, %v1483_v32 }
 0x432   : > { %v2488_v39 = vpop.eup %2487  ;;  %2501 = vrsqrt.f32 %v1442_v8  ;;  %v1420_v63 = vsub.f32 %v1372_v16, %v1396_v57  ;;  %2346 = vmatmul.mubr.f32.gmra.mxu1 %v1542_v35  ;;  %v1350_v54 = vpop.xlane.xlu0 %1349  ;;  %v1513_v45 = vmul.f32 %v3435_v24, %v1482_v55 }
 0x433   : > { %v2490_v5 = vpop.eup %2489  ;;  %v1445_v44 = vadd.f32 1e-05, %v1421_v1  ;;  %v1348_v52 = vpop.xlane.xlu1 %1347  ;;  %2348 = vmatprep.mubr.f32.mxu1 %v1543_v56  ;;  %v1375_v21 = vmul.f32 0.015625, %v1350_v54  ;;  %v1545_v18 = vadd.f32 %v3445_v22, %v1514_v59  ;;  %v1485_v6 = vmul.f32 %v2488_v39, %v3309_v62 }
 0x434   : > { %v1444_v26 = vadd.f32 1e-05, %v1420_v63  ;;  %v1374_v9 = vmul.f32 0.015625, %v1348_v52  ;;  %v1544_v33 = vadd.f32 %v3445_v22, %v1513_v45  ;;  %v1484_v10 = vmul.f32 %v2490_v5, %v3304_v58 }
 0x435   : > { %2503 = vrsqrt.f32 %v1445_v44  ;;  %v1423_v42 = vsub.f32 %v1375_v21, %v1399_v20  ;;  %v1516_v60 = vmul.f32 %v3435_v24, %v1485_v6  ;;  %v1400_v62 = vmul.f32 %v3401_v4, %v3401_v4 }
 0x436   : > { %v2492_v37 = vpop.eup %2491  ;;  %2505 = vrsqrt.f32 %v1444_v26  ;;  %v1422_v14 = vsub.f32 %v1374_v9, %v1398_v38  ;;  %2349 = vmatmul.mubr.f32.gmra.mxu1 %v1544_v33  ;;  %v1515_v40 = vmul.f32 %v3435_v24, %v1484_v10  ;;  %v3547_v26 = vld [vmem:[%s3661_s10] ss:$0 sm:$0xff] }
 0x437   : > { %v2494_v19 = vpop.eup %2493  ;;  %v1447_v43 = vadd.f32 1e-05, %v1423_v42  ;;  %v1352_v30 = vpop.xlane.xlu1 %1351  ;;  %2351 = vmatprep.mubr.f32.mxu1 %v1545_v18  ;;  %v1547_v41 = vadd.f32 %v3445_v22, %v1516_v60  ;;  %v1487_v58 = vmul.f32 %v2492_v37, %v3327_v2 }
 0x438   : > { %v1446_v50 = vadd.f32 1e-05, %v1422_v14  ;;  %v1376_v47 = vmul.f32 0.015625, %v1352_v30  ;;  %v1546_v36 = vadd.f32 %v3445_v22, %v1515_v40  ;;  %v1486_v57 = vmul.f32 %v2494_v19, %v3322_v0 }
 0x439   : > { %2507 = vrsqrt.f32 %v1447_v43  ;;  %v1518_v27 = vmul.f32 %v3435_v24, %v1487_v58 }
 0x43a   : > { %v2496_v53 = vpop.eup %2495  ;;  %2509 = vrsqrt.f32 %v1446_v50  ;;  %v1424_v34 = vsub.f32 %v1376_v47, %v1400_v62  ;;  %2352 = vmatmul.mubr.f32.gmra.mxu1 %v1546_v36  ;;  %v1517_v4 = vmul.f32 %v3435_v24, %v1486_v57 }
 0x43b   : > { %v2498_v51 = vpop.eup %2497  ;;  %2354 = vmatprep.mubr.f32.mxu1 %v1547_v41  ;;  %v1549_v25 = vadd.f32 %v3445_v22, %v1518_v27  ;;  %v1489_v2 = vmul.f32 %v2496_v53, %v3345_v11 }
 0x43c   : > { %v1448_v48 = vadd.f32 1e-05, %v1424_v34  ;;  %v1548_v12 = vadd.f32 %v3445_v22, %v1517_v4  ;;  %v1488_v0 = vmul.f32 %v2498_v51, %v3340_v7 }
 0x43d   : > { %v1520_v61 = vmul.f32 %v3435_v24, %v1489_v2 }
 0x43e   : > { %v2500_v49 = vpop.eup %2499  ;;  %2511 = vrsqrt.f32 %v1448_v48  ;;  %2355 = vmatmul.mubr.f32.gmra.mxu1 %v1548_v12  ;;  %v1519_v46 = vmul.f32 %v3435_v24, %v1488_v0 }
 0x43f   : > { %v2502_v28 = vpop.eup %2501  ;;  %2357 = vmatprep.mubr.f32.mxu1 %v1549_v25  ;;  %v1551_v56 = vadd.f32 %v3445_v22, %v1520_v61  ;;  %v1491_v32 = vmul.f32 %v2500_v49, %v3363_v17 }
 0x440   : > { %v1550_v11 = vadd.f32 %v3445_v22, %v1519_v46  ;;  %v1490_v8 = vmul.f32 %v2502_v28, %v3358_v13 }
 0x441   : > { %v1522_v16 = vmul.f32 %v3435_v24, %v1491_v32 }
 0x442   : > { %v2504_v7 = vpop.eup %2503  ;;  %2358 = vmatmul.mubr.f32.gmra.mxu1 %v1550_v11  ;;  %v1521_v35 = vmul.f32 %v3435_v24, %v1490_v8 }
 0x443   : > { %v2506_v55 = vpop.eup %2505  ;;  %2360 = vmatprep.mubr.f32.mxu1 %v1551_v56  ;;  %v1553_v38 = vadd.f32 %v3445_v22, %v1522_v16  ;;  %v1493_v1 = vmul.f32 %v2504_v7, %v3381_v3 }
 0x444   : > { %v1552_v59 = vadd.f32 %v3445_v22, %v1521_v35  ;;  %v1492_v17 = vmul.f32 %v2506_v55, %v3376_v23 }
 0x445   : > { %v1524_v39 = vmul.f32 %v3435_v24, %v1493_v1 }
 0x446   : > { %v2508_v20 = vpop.eup %2507  ;;  %2361 = vmatmul.mubr.f32.gmra.mxu1 %v1552_v59  ;;  %v1523_v13 = vmul.f32 %v3435_v24, %v1492_v17 }
 0x447   : > { %v2510_v63 = vpop.eup %2509  ;;  %2363 = vmatprep.mubr.f32.mxu1 %v1553_v38  ;;  %v1555_v54 = vadd.f32 %v3445_v22, %v1524_v39  ;;  %v1495_v45 = vmul.f32 %v2508_v20, %v3399_v15 }
 0x448   : > { %v1554_v5 = vadd.f32 %v3445_v22, %v1523_v13  ;;  %v1494_v3 = vmul.f32 %v2510_v63, %v3394_v31 }
 0x449   : > { %v1526_v44 = vmul.f32 %v3435_v24, %v1495_v45 }
 0x44a   : > { %2364 = vmatmul.mubr.f32.gmra.mxu1 %v1554_v5  ;;  %v1525_v23 = vmul.f32 %v3435_v24, %v1494_v3 }
 0x44b   : > { %v2512_v52 = vpop.eup %2511  ;;  %2366 = vmatprep.mubr.f32.mxu1 %v1555_v54  ;;  %v1557_v21 = vadd.f32 %v3445_v22, %v1526_v44 }
 0x44c   : > { %v1556_v18 = vadd.f32 %v3445_v22, %v1525_v23  ;;  %v1496_v6 = vmul.f32 %v2512_v52, %v3410_v29 }
 0x44e   : > { %2367 = vmatmul.mubr.f32.gmra.mxu1 %v1556_v18  ;;  %v1527_v15 = vmul.f32 %v3435_v24, %v1496_v6 }
 0x44f   : > { %2369 = vmatprep.mubr.f32.mxu1 %v1557_v21 }
 0x450   : > { %v1558_v31 = vadd.f32 %v3445_v22, %v1527_v15 }
 0x452   : > { %2370 = vmatmul.mubr.f32.gmra.mxu1 %v1558_v31 }
 0x4e6   : > { %v2338_v9 = vpop.f32.mrf.mxu1 }
 0x4e7   : > { %v1654_v33 = vadd.f32 %v2338_v9, %v3547_v26 }
 0x4e8   : > { %v1648_v10 = vpop.f32.mrf.mxu1 }
 0x4e9   : > { %1768 = vst [vmem:[%s3552_s14 + $0x8] sm:$0xff] %v1654_v33  ;;  %v1649_v29 = vadd.f32 %v3547_v26, %v1648_v10 }
 0x4ea   : > { %v2341_v24 = vpop.f32.mrf.mxu1 }
 0x4eb   : > { %1767 = vst [vmem:[%s3552_s14] sm:$0xff] %v1649_v29  ;;  %v1664_v22 = vadd.f32 %v2341_v24, %v3547_v26 }
 0x4ec   : > { %v1658_v42 = vpop.f32.mrf.mxu1 }
 0x4ed   : > { %1770 = vst [vmem:[%s3552_s14 + $0x18] sm:$0xff] %v1664_v22  ;;  %v1659_v60 = vadd.f32 %v3547_v26, %v1658_v42 }
 0x4ee   : > { %v2344_v37 = vpop.f32.mrf.mxu1 }
 0x4ef   : > { %1769 = vst [vmem:[%s3552_s14 + $0x10] sm:$0xff] %v1659_v60  ;;  %v1674_v14 = vadd.f32 %v2344_v37, %v3547_v26 }
 0x4f0   : > { %v1668_v40 = vpop.f32.mrf.mxu1 }
 0x4f1   : > { %1772 = vst [vmem:[%s3552_s14 + $0x28] sm:$0xff] %v1674_v14  ;;  %v1669_v19 = vadd.f32 %v3547_v26, %v1668_v40 }
 0x4f2   : > { %v2347_v62 = vpop.f32.mrf.mxu1 }
 0x4f3   : > { %1771 = vst [vmem:[%s3552_s14 + $0x20] sm:$0xff] %v1669_v19  ;;  %v1684_v43 = vadd.f32 %v2347_v62, %v3547_v26 }
 0x4f4   : > { %v1678_v30 = vpop.f32.mrf.mxu1 }
 0x4f5   : > { %1774 = vst [vmem:[%s3552_s14 + $0x38] sm:$0xff] %v1684_v43  ;;  %v1679_v41 = vadd.f32 %v3547_v26, %v1678_v30 }
 0x4f6   : > { %v2350_v58 = vpop.f32.mrf.mxu1 }
 0x4f7   : > { %1773 = vst [vmem:[%s3552_s14 + $0x30] sm:$0xff] %v1679_v41  ;;  %v1694_v50 = vadd.f32 %v2350_v58, %v3547_v26 }
 0x4f8   : > { %v1688_v47 = vpop.f32.mrf.mxu1 }
 0x4f9   : > { %1776 = vst [vmem:[%s3552_s14 + $0x48] sm:$0xff] %v1694_v50  ;;  %v1689_v36 = vadd.f32 %v3547_v26, %v1688_v47 }
 0x4fa   : > { %v2353_v57 = vpop.f32.mrf.mxu1 }
 0x4fb   : > { %1775 = vst [vmem:[%s3552_s14 + $0x40] sm:$0xff] %v1689_v36  ;;  %v1704_v27 = vadd.f32 %v2353_v57, %v3547_v26 }
 0x4fc   : > { %v1698_v53 = vpop.f32.mrf.mxu1 }
 0x4fd   : > { %1778 = vst [vmem:[%s3552_s14 + $0x58] sm:$0xff] %v1704_v27  ;;  %v1699_v34 = vadd.f32 %v3547_v26, %v1698_v53 }
 0x4fe   : > { %v2356_v4 = vpop.f32.mrf.mxu1 }
 0x4ff   : > { %1777 = vst [vmem:[%s3552_s14 + $0x50] sm:$0xff] %v1699_v34  ;;  %v1714_v51 = vadd.f32 %v2356_v4, %v3547_v26 }
 0x500   : > { %v1708_v25 = vpop.f32.mrf.mxu1 }
 0x501   : > { %1780 = vst [vmem:[%s3552_s14 + $0x68] sm:$0xff] %v1714_v51  ;;  %v1709_v2 = vadd.f32 %v3547_v26, %v1708_v25 }
 0x502   : > { %v2359_v48 = vpop.f32.mrf.mxu1 }
 0x503   : > { %1779 = vst [vmem:[%s3552_s14 + $0x60] sm:$0xff] %v1709_v2  ;;  %v1724_v12 = vadd.f32 %v2359_v48, %v3547_v26 }
 0x504   : > { %v1718_v0 = vpop.f32.mrf.mxu1 }
 0x505   : > { %1782 = vst [vmem:[%s3552_s14 + $0x78] sm:$0xff] %v1724_v12  ;;  %v1719_v61 = vadd.f32 %v3547_v26, %v1718_v0 }
 0x506   : > { %v2362_v49 = vpop.f32.mrf.mxu1 }
 0x507   : > { %1781 = vst [vmem:[%s3552_s14 + $0x70] sm:$0xff] %v1719_v61  ;;  %v1734_v46 = vadd.f32 %v2362_v49, %v3547_v26 }
 0x508   : > { %v1728_v28 = vpop.f32.mrf.mxu1 }
 0x509   : > { %1784 = vst [vmem:[%s3552_s14 + $0x88] sm:$0xff] %v1734_v46  ;;  %v1729_v56 = vadd.f32 %v3547_v26, %v1728_v28 }
 0x50a   : > { %v2365_v32 = vpop.f32.mrf.mxu1 }
 0x50b   : > { %1783 = vst [vmem:[%s3552_s14 + $0x80] sm:$0xff] %v1729_v56  ;;  %v1744_v11 = vadd.f32 %v2365_v32, %v3547_v26 }
 0x50c   : > { %v1738_v8 = vpop.f32.mrf.mxu1 }
 0x50d   : > { %1786 = vst [vmem:[%s3552_s14 + $0x98] sm:$0xff] %v1744_v11  ;;  %v1739_v16 = vadd.f32 %v3547_v26, %v1738_v8 }
 0x50e   : > { %v2368_v7 = vpop.f32.mrf.mxu1 }
 0x50f   : > { %1785 = vst [vmem:[%s3552_s14 + $0x90] sm:$0xff] %v1739_v16  ;;  %v1754_v35 = vadd.f32 %v2368_v7, %v3547_v26 }
 0x510   : > { %v1748_v55 = vpop.f32.mrf.mxu1 }
 0x511   : > { %1788 = vst [vmem:[%s3552_s14 + $0xa8] sm:$0xff] %v1754_v35  ;;  %v1749_v38 = vadd.f32 %v3547_v26, %v1748_v55 }
 0x512   : > { %v2371_v1 = vpop.f32.mrf.mxu1 }
 0x513   : > { %1787 = vst [vmem:[%s3552_s14 + $0xa0] sm:$0xff] %v1749_v38  ;;  %v1764_v59 = vadd.f32 %v2371_v1, %v3547_v26 }
 0x514   : > { %v1758_v17 = vpop.f32.mrf.mxu1 }
 0x515   : > { %1790 = vst [vmem:[%s3552_s14 + $0xb8] sm:$0xff] %v1764_v59  ;;  %v1759_v39 = vadd.f32 %v3547_v26, %v1758_v17 }
 0x517   : > { %1789 = vst [vmem:[%s3552_s14 + $0xb0] sm:$0xff] %v1759_v39 }
 0x518   : > { %2658 = shalt.err (!%p2655_p5)
}
 0x519   : > { %s2659_s9 = scalar_lea.hbm %s3603_s22, 3072  ;;  %s2663_s29 = scalar_lea.hbm %s3662_s11, 6144 }
 0x51a   : > { %p2660_p6 = scmp.ne.s32.totalorder %s3603_s22, %s2659_s9  ;;  %p2664_p9 = scmp.lt.s32.totalorder %s3603_s22, %s3662_s11 }
 0x51b   : > { %p2665_p11 = scmp.lt.s32.totalorder %s2663_s29, %s2659_s9 }
 0x51c   : > { %p2661_p4 = pnand %p2660_p6, %p3692_p12 }
 0x51d   : > { %p2666_p3 = por %p2665_p11, %p2664_p9 }
 0x51e   : > { %p2662_p8 = pneg %p2661_p4 }
 0x520   : > { %p2667_p10 = pnand %p2666_p3, %p2662_p8 }
 0x522   : > { %2670 = shalt.err (!%p2667_p10)
}
 0x523   : > { %s2727_s23 = smov 128   ;;  %s2728_s25 = smov 8  }
 0x524   : > { %2392 = dma.vmem_to_hbm [thread:$0]  (%p3692_p12), %s3605_s3, 3072, %s3603_s22, %s1792_s21, %s2727_s23, %s2727_s23, %s2728_s25  }
 0x525 PF: > { %s1820_s28 = sand.u32 1, %s2705_s17   ;;  %p3693_p7 = scmp.ne.s32.totalorder %s3674_s24, 0 }
 0x526   : > { %p3694_p1 = scmp.ge.s32.totalorder %s2717_s20, 2  ;;  %s1821_s1 = scalar_lea.sflag [#allocation4], %s1820_s28 }
 0x528   : > { %p2412_p13 = pnand %p3694_p1, %p3693_p7 }
 0x52a   : > { %p2413_p0 = pneg %p2412_p13 }
 0x52c   : > { %2700 = dma.done.wait (%p2413_p0), %s1821_s1, 3072  }
 0x52d   : > { %2702 = vsyncadd (%p2413_p0), %s1821_s1, 4294964224  ;;  %s3695_s12 = sld [smem:[#allocation16_spill]]  ;;  %p26_p2 = scmp.ge.s32.totalorder %s2889_s27, 4  }
 0x52e   : > { %s3696_s17 = smov %s2709_s18  ;;  %s3697_s18 = smov %s2713_s19 }
 0x52f   : > { %s3699_s20 = smov %s2889_s27  ;;  %28 = sbr.rel (!%p26_p2) target bundleno = 12 (0xc), region = 125 }
 0x533   : > { %s3698_s19 = smov %s3695_s12 }
 0x534   :  { %1826 = vsyncpa [#allocation3], 1 }
 0x535   :  { %1828 = vsyncpa [#allocation3 + $0x1], 1 }
 0x536   :  { %1829 = vsyncpa [#allocation6], 1 }
 0x537   :  { %1830 = vsyncpa [#allocation9], 1 }
 0x538   :  { %1831 = vsyncpa [#allocation4], 1 }
 0x539   :  { %1833 = vsyncpa [#allocation4 + $0x1], 1 }

</bundles_post_ra>
